<compile_context>
chip_gen: v7x
topology: tpu7x:2x2x1
jax: 0.10.0
libtpu: 0.0.40
codegen_flags: <defaults>
</compile_context>

<pallas_src>
import numpy as np

import jax
import jax.numpy as jnp
from jax import lax
from jax.experimental import pallas as pl
from jax.experimental.pallas import tpu as pltpu

_EPS = 1e-5
_LANES = 128                      # every slab is padded to 128 lanes

# fixed decoder geometry
_H0, _H1, _H2, _H3 = 3, 7, 14, 28
_C0, _C1, _C2, _C3 = 32, 16, 8, 3


# ---------------------------------------------------------------------------
# Fused decoder kernel (whole forward pass, single invocation, all in VMEM)
# ---------------------------------------------------------------------------
def _make_decoder_kernel(batch, enc_dim):
    b = batch
    inv_n1 = 1.0 / (b * _H1 * _H1)
    inv_n2 = 1.0 / (b * _H2 * _H2)

    def kernel(x_ref, wenc_ref, rv_ref, m_ref, s_ref, pc_ref, bcg_ref,
               o_ref, x0_ref):
        def mm(lhs, rhs):
            return jnp.dot(lhs, rhs, preferred_element_type=jnp.float32)

        # ---- decoder_lin: Linear(E,128) + ReLU -----------------------------
        w1 = wenc_ref[3 * _LANES:3 * _LANES + enc_dim, :]
        h1 = jnp.maximum(mm(x_ref[...], w1) + rv_ref[0:1], 0.0)        # (B,128)

        # ---- Linear(128,288) + ReLU, unflattened straight into the h-major
        #      (3B,128) NHWC slab (Eu row placement folded into S1 below) ----
        for h in range(3):
            w2h = wenc_ref[h * _LANES:(h + 1) * _LANES, :]
            ah = jnp.maximum(mm(h1, w2h) + rv_ref[1 + h:2 + h], 0.0)   # (B,128)
            x0_ref[h * b:(h + 1) * b, :] = ah

        # ---- ConvTranspose as  sum_kh  S_kh @ X @ M_kh  (real MACs only) ---
        def convt(x2d, layer, rows, cols):
            acc = None
            for kh in range(3):
                t = mm(x2d, m_ref[3 * layer + kh])                     # (.,128)
                s_kh = s_ref[3 * layer + kh][0:rows, 0:cols]
                contrib = mm(s_kh, t)
                acc = contrib if acc is None else acc + contrib
            return acc

        # ---- training-mode BatchNorm + ReLU (two-moment form) --------------
        def bn_relu(y, idx, inv_n):
            pc = pc_ref[idx]                       # (128,16) per-channel fold
            bcg = bcg_ref[idx]                     # (16,128) gamma*broadcast
            sum_y = jnp.sum(y, axis=0, keepdims=True)
            sum_y2 = jnp.sum(y * y, axis=0, keepdims=True)
            mean_c = mm(sum_y, pc) * inv_n                              # (1,16)
            var_c = mm(sum_y2, pc) * inv_n - mean_c * mean_c
            rs = lax.rsqrt(var_c + _EPS)
            scale = mm(rs, bcg)                                         # (1,128)
            shift = mm(mean_c * rs, bcg)
            be_row = rv_ref[4 + idx:5 + idx]
            return jnp.maximum(y * scale - shift + be_row, 0.0)

        y1 = bn_relu(convt(x0_ref[...], 0, b * _H1, b * _H0), 0, inv_n1)
        y2 = bn_relu(convt(y1, 1, b * _H2, b * _H1), 1, inv_n2)
        y3 = convt(y2, 2, b * _H3, b * _H2) + rv_ref[6:7]               # (28B,128)
        o_ref[...] = jax.nn.sigmoid(y3)

    return kernel


# ---------------------------------------------------------------------------
# One-time host-side constant folding (pure layout / weight folding)
# ---------------------------------------------------------------------------
def _convt_fold(w_t, hin, win, stride, padding, out_padding):
    """ConvTranspose2d (torch weight (Cin,Cout,K,K)) -> padded lane matrices
    M_kh (128,128) and the per-sample row-scatter s (K,Hout,Hin)."""
    w_np = np.asarray(w_t, np.float32)
    cin, cout, k, _ = w_np.shape
    hout = (hin - 1) * stride - 2 * padding + k + out_padding
    wout = (win - 1) * stride - 2 * padding + k + out_padding

    place = np.zeros((win, k, wout), np.float32)
    for iw in range(win):
        for kw in range(k):
            ow = iw * stride - padding + kw
            if 0 <= ow < wout:
                place[iw, kw, ow] = 1.0
    m = np.einsum("ukv,cdhk->hucvd", place, w_np).reshape(k, win * cin,
                                                          wout * cout)
    m_pad = np.zeros((k, _LANES, _LANES), np.float32)
    m_pad[:, :win * cin, :wout * cout] = m

    s = np.zeros((k, hout, hin), np.float32)
    for kh in range(k):
        for ih in range(hin):
            oh = ih * stride - padding + kh
            if 0 <= oh < hout:
                s[kh, oh, ih] = 1.0
    return m_pad, s


def _bn_fold(gamma, beta, wout, cout):
    g = np.asarray(gamma, np.float32)
    bt = np.asarray(beta, np.float32)
    pc = np.zeros((_LANES, 16), np.float32)
    bcg = np.zeros((16, _LANES), np.float32)
    be = np.zeros((_LANES,), np.float32)
    for w in range(wout):
        for c in range(cout):
            pc[w * cout + c, c] = 1.0
            bcg[c, w * cout + c] = g[c]
            be[w * cout + c] = bt[c]
    return pc, bcg, be


def build_decoder_consts(params, batch):
    """Fold all decoder weights into 6 packed device slabs (call once)."""
    e = params["w1"].shape[0]

    # Linear2 columns permuted per spatial row h: torch (c,h,w) -> lane (w,c)
    w2 = np.asarray(params["w2"], np.float32)
    b2 = np.asarray(params["b2"], np.float32)
    w2s = np.zeros((3, _LANES, _LANES), np.float32)
    b2s = np.zeros((3, _LANES), np.float32)
    for h in range(3):
        for w in range(3):
            for c in range(_C0):
                src = c * 9 + h * 3 + w
                dst = w * _C0 + c
                w2s[h, :, dst] = w2[:, src]
                b2s[h, dst] = b2[src]

    m1, s1 = _convt_fold(params["ct1_w"], _H0, _H0, 2, 0, 0)
    m2, s2 = _convt_fold(params["ct2_w"], _H1, _H1, 2, 1, 1)
    m3, s3 = _convt_fold(params["ct3_w"], _H2, _H2, 2, 1, 1)
    m_all = np.concatenate([m1, m2, m3], axis=0)                 # (9,128,128)

    # Layer 1 row scatter with the unflatten (Eu) placement folded in:
    # input rows are h-major (ih*B + b), output rows b-major (b*H1 + oh).
    s1b = np.zeros((3, batch * _H1, _H0 * batch), np.float32)
    for bb in range(batch):
        for ih in range(_H0):
            s1b[:, bb * _H1:(bb + 1) * _H1, ih * batch + bb] = s1[:, :, ih]

    # Layers 2/3: block-diagonal per-sample placement (b-major both sides).
    # TODO(synk): O(batch^2); grid the batch with per-sample S for large B.
    def _kron_batch(s):
        k, hout, hin = s.shape
        out = np.zeros((k, batch * hout, batch * hin), np.float32)
        for bb in range(batch):
            out[:, bb * hout:(bb + 1) * hout, bb * hin:(bb + 1) * hin] = s
        return out

    s_all = np.zeros((9, batch * _H3, batch * _H2), np.float32)
    s_all[0:3, :batch * _H1, :batch * _H0] = s1b
    s_all[3:6, :batch * _H2, :batch * _H1] = _kron_batch(s2)
    s_all[6:9] = _kron_batch(s3)

    pc1, bcg1, be1 = _bn_fold(params["bn1_g"], params["bn1_b"], _H1, _C1)
    pc2, bcg2, be2 = _bn_fold(params["bn2_g"], params["bn2_b"], _H2, _C2)
    pc_all = np.stack([pc1, pc2])                                # (2,128,16)
    bcg_all = np.stack([bcg1, bcg2])                             # (2,16,128)

    # packed weight slab: rows [0,384) = 3 per-h Linear2 slices, then Linear1.
    wenc = np.zeros((3 * _LANES + e, _LANES), np.float32)
    for h in range(3):
        wenc[h * _LANES:(h + 1) * _LANES] = w2s[h]
    wenc[3 * _LANES:3 * _LANES + e] = np.asarray(params["w1"], np.float32)

    # packed row-vector slab: b1 | b2(h=0..2) | bn1 beta | bn2 beta | ct3 bias
    # (ConvT1/ConvT2 biases dropped: they cancel under training-mode BN.)
    rv = np.zeros((7, _LANES), np.float32)
    rv[0] = np.asarray(params["b1"], np.float32)
    rv[1:4] = b2s
    rv[4] = be1
    rv[5] = be2
    b3 = np.asarray(params["ct3_b"], np.float32)
    for w in range(_H3):
        rv[6, w * _C3:(w + 1) * _C3] = b3

    return {
        "wenc": jnp.asarray(wenc), "rv": jnp.asarray(rv),
        "m": jnp.asarray(m_all), "s": jnp.asarray(s_all),
        "pc": jnp.asarray(pc_all), "bcg": jnp.asarray(bcg_all),
    }


# ---------------------------------------------------------------------------
# Jitted forward (single Pallas kernel) and pure-JAX reference
# ---------------------------------------------------------------------------
@jax.jit
def decoder_forward(x, consts):
    batch, enc_dim = x.shape
    kernel = _make_decoder_kernel(batch, enc_dim)
    vmem = pl.BlockSpec(memory_space=pltpu.MemorySpace.VMEM)
    out2d = pl.pallas_call(
        kernel,
        out_shape=jax.ShapeDtypeStruct((batch * _H3, _LANES), jnp.float32),
        in_specs=[vmem] * 7,
        out_specs=vmem,
        scratch_shapes=[pltpu.VMEM((3 * batch, _LANES), jnp.float32)],
    )(x, consts["wenc"], consts["rv"], consts["m"], consts["s"],
      consts["pc"], consts["bcg"])
    # lane-dense (B*28, 128) slab -> slice the 84 real lanes -> NCHW (tiny)
    img = out2d[:, :_H3 * _C3].reshape(batch, _H3, _H3, _C3)
    return jnp.transpose(img, (0, 3, 1, 2))


def ref_forward(x, p):
    hp = lax.Precision.HIGHEST
    h = jnp.maximum(jnp.dot(x, p["w1"], precision=hp) + p["b1"], 0.0)
    h = jnp.maximum(jnp.dot(h, p["w2"], precision=hp) + p["b2"], 0.0)
    n = x.shape[0]
    h = h.reshape(n, 32, 3, 3).transpose(0, 2, 3, 1)

    def convT(xx, w_t, b, stride, padding, output_padding):
        k = w_t.shape[2]
        w_hwio = jnp.transpose(w_t[:, :, ::-1, ::-1], (2, 3, 0, 1))
        lo = k - 1 - padding
        hi = lo + output_padding
        y = lax.conv_general_dilated(
            xx, w_hwio, window_strides=(1, 1),
            padding=[(lo, hi), (lo, hi)], lhs_dilation=(stride, stride),
            dimension_numbers=("NHWC", "HWIO", "NHWC"), precision=hp)
        return y + b

    def bn_relu(y, g, b):
        mean = y.mean(axis=(0, 1, 2), keepdims=True)
        var = ((y - mean) ** 2).mean(axis=(0, 1, 2), keepdims=True)
        return jnp.maximum((y - mean) * lax.rsqrt(var + _EPS) * g + b, 0.0)

    h = bn_relu(convT(h, p["ct1_w"], p["ct1_b"], 2, 0, 0), p["bn1_g"], p["bn1_b"])
    h = bn_relu(convT(h, p["ct2_w"], p["ct2_b"], 2, 1, 1), p["bn2_g"], p["bn2_b"])
    h = jax.nn.sigmoid(convT(h, p["ct3_w"], p["ct3_b"], 2, 1, 1))
    return jnp.transpose(h, (0, 3, 1, 2))


def init_params(key, encoded_space_dim):
    ks = jax.random.split(key, 14)
    nrm = lambda k, s, sc=0.1: sc * jax.random.normal(k, s, jnp.float32)
    return {
        "w1": nrm(ks[0], (encoded_space_dim, 128)), "b1": nrm(ks[1], (128,)),
        "w2": nrm(ks[2], (128, 3 * 3 * 32)),        "b2": nrm(ks[3], (288,)),
        "ct1_w": nrm(ks[4], (32, 16, 3, 3)), "ct1_b": nrm(ks[5], (16,)),
        "ct2_w": nrm(ks[6], (16, 8, 3, 3)),  "ct2_b": nrm(ks[7], (8,)),
        "ct3_w": nrm(ks[8], (8, 3, 3, 3)),   "ct3_b": nrm(ks[9], (3,)),
        "bn1_g": 1.0 + nrm(ks[10], (16,)), "bn1_b": nrm(ks[11], (16,)),
        "bn2_g": 1.0 + nrm(ks[12], (8,)),  "bn2_b": nrm(ks[13], (8,)),
    }


if __name__ == "__main__":
    key = jax.random.PRNGKey(0)
    k_in, k_par = jax.random.split(key)
    batch, encoded_space_dim = 2, 4
    x = jax.random.normal(k_in, (batch, encoded_space_dim), jnp.float32)
    params = init_params(k_par, encoded_space_dim)

    consts = build_decoder_consts(params, batch)     # one-time host folding
    out = jax.block_until_ready(decoder_forward(x, consts))
    assert out.shape == (batch, 3, 28, 28), out.shape
    assert bool(jnp.all(jnp.isfinite(out)))

    ref = ref_forward(x, params)
    max_err = float(jnp.max(jnp.abs(out - ref)))
    assert max_err < 1e-3, f"mismatch vs reference: {max_err}"

    print("KERNEL_OK")
</pallas_src>

<mosaic_0001>
module attributes {stable_mosaic.version = 11 : i64} {
  func.func @kernel(%arg0: memref<2x4xf32, #tpu.memory_space<vmem>>, %arg1: memref<388x128xf32, #tpu.memory_space<vmem>>, %arg2: memref<7x128xf32, #tpu.memory_space<vmem>>, %arg3: memref<9x128x128xf32, #tpu.memory_space<vmem>>, %arg4: memref<9x56x28xf32, #tpu.memory_space<vmem>>, %arg5: memref<2x128x16xf32, #tpu.memory_space<vmem>>, %arg6: memref<2x16x128xf32, #tpu.memory_space<vmem>>, %arg7: memref<56x128xf32, #tpu.memory_space<vmem>>, %arg8: memref<6x128xf32, #tpu.memory_space<vmem>>) attributes {dimension_semantics = [], scalar_prefetch = 0 : i64, scratch_operands = 1 : i64, tpu.core_type = #tpu.core_type<tc>} {
    %c384 = arith.constant 384 : index
    %c0 = arith.constant 0 : index
    %0 = vector.load %arg1[%c384, %c0] : memref<388x128xf32, #tpu.memory_space<vmem>>, vector<4x128xf32>
    %c0_0 = arith.constant 0 : index
    %c0_1 = arith.constant 0 : index
    %1 = vector.load %arg0[%c0_0, %c0_1] : memref<2x4xf32, #tpu.memory_space<vmem>>, vector<2x4xf32>
    %cst = arith.constant dense<0.000000e+00> : vector<2x128xf32>
    %2 = tpu.matmul %1, %0, %cst {dimension_numbers = #tpu.dot_dimension_numbers<[1], [0], [0], [1], [0, 0, 1, 1], [], []>} : vector<2x4xf32>, vector<4x128xf32>, vector<2x128xf32> -> vector<2x128xf32>
    %c0_2 = arith.constant 0 : index
    %c0_3 = arith.constant 0 : index
    %3 = vector.load %arg2[%c0_2, %c0_3] : memref<7x128xf32, #tpu.memory_space<vmem>>, vector<1x128xf32>
    %4 = vector.broadcast %3 : vector<1x128xf32> to vector<2x128xf32>
    %5 = arith.addf %2, %4 : vector<2x128xf32>
    %cst_4 = arith.constant 0.000000e+00 : f32
    %6 = vector.broadcast %cst_4 : f32 to vector<2x128xf32>
    %7 = arith.maximumf %5, %6 : vector<2x128xf32>
    %c0_5 = arith.constant 0 : index
    %c0_6 = arith.constant 0 : index
    %8 = vector.load %arg1[%c0_5, %c0_6] : memref<388x128xf32, #tpu.memory_space<vmem>>, vector<128x128xf32>
    %cst_7 = arith.constant dense<0.000000e+00> : vector<2x128xf32>
    %9 = tpu.matmul %7, %8, %cst_7 {dimension_numbers = #tpu.dot_dimension_numbers<[1], [0], [0], [1], [0, 0, 1, 1], [], []>} : vector<2x128xf32>, vector<128x128xf32>, vector<2x128xf32> -> vector<2x128xf32>
    %c1 = arith.constant 1 : index
    %c0_8 = arith.constant 0 : index
    %10 = vector.load %arg2[%c1, %c0_8] : memref<7x128xf32, #tpu.memory_space<vmem>>, vector<1x128xf32>
    %11 = vector.broadcast %10 : vector<1x128xf32> to vector<2x128xf32>
    %12 = arith.addf %9, %11 : vector<2x128xf32>
    %cst_9 = arith.constant 0.000000e+00 : f32
    %13 = vector.broadcast %cst_9 : f32 to vector<2x128xf32>
    %14 = arith.maximumf %12, %13 : vector<2x128xf32>
    %c0_10 = arith.constant 0 : index
    %c0_11 = arith.constant 0 : index
    %15 = vector.load %arg8[%c0_10, %c0_11] : memref<6x128xf32, #tpu.memory_space<vmem>>, vector<2x128xf32>
    tpu.vector_store %arg8[%c0_10, %c0_11], %14 {strides = array<i32>} : memref<6x128xf32, #tpu.memory_space<vmem>>, vector<2x128xf32>,
    %c128 = arith.constant 128 : index
    %c0_12 = arith.constant 0 : index
    %16 = vector.load %arg1[%c128, %c0_12] : memref<388x128xf32, #tpu.memory_space<vmem>>, vector<128x128xf32>
    %cst_13 = arith.constant dense<0.000000e+00> : vector<2x128xf32>
    %17 = tpu.matmul %7, %16, %cst_13 {dimension_numbers = #tpu.dot_dimension_numbers<[1], [0], [0], [1], [0, 0, 1, 1], [], []>} : vector<2x128xf32>, vector<128x128xf32>, vector<2x128xf32> -> vector<2x128xf32>
    %c2 = arith.constant 2 : index
    %c0_14 = arith.constant 0 : index
    %18 = vector.load %arg2[%c2, %c0_14] : memref<7x128xf32, #tpu.memory_space<vmem>>, vector<1x128xf32>
    %19 = vector.broadcast %18 : vector<1x128xf32> to vector<2x128xf32>
    %20 = arith.addf %17, %19 : vector<2x128xf32>
    %cst_15 = arith.constant 0.000000e+00 : f32
    %21 = vector.broadcast %cst_15 : f32 to vector<2x128xf32>
    %22 = arith.maximumf %20, %21 : vector<2x128xf32>
    %c2_16 = arith.constant 2 : index
    %c0_17 = arith.constant 0 : index
    %23 = vector.load %arg8[%c2_16, %c0_17] : memref<6x128xf32, #tpu.memory_space<vmem>>, vector<2x128xf32>
    tpu.vector_store %arg8[%c2_16, %c0_17], %22 {strides = array<i32>} : memref<6x128xf32, #tpu.memory_space<vmem>>, vector<2x128xf32>,
    %c256 = arith.constant 256 : index
    %c0_18 = arith.constant 0 : index
    %24 = vector.load %arg1[%c256, %c0_18] : memref<388x128xf32, #tpu.memory_space<vmem>>, vector<128x128xf32>
    %cst_19 = arith.constant dense<0.000000e+00> : vector<2x128xf32>
    %25 = tpu.matmul %7, %24, %cst_19 {dimension_numbers = #tpu.dot_dimension_numbers<[1], [0], [0], [1], [0, 0, 1, 1], [], []>} : vector<2x128xf32>, vector<128x128xf32>, vector<2x128xf32> -> vector<2x128xf32>
    %c3 = arith.constant 3 : index
    %c0_20 = arith.constant 0 : index
    %26 = vector.load %arg2[%c3, %c0_20] : memref<7x128xf32, #tpu.memory_space<vmem>>, vector<1x128xf32>
    %27 = vector.broadcast %26 : vector<1x128xf32> to vector<2x128xf32>
    %28 = arith.addf %25, %27 : vector<2x128xf32>
    %cst_21 = arith.constant 0.000000e+00 : f32
    %29 = vector.broadcast %cst_21 : f32 to vector<2x128xf32>
    %30 = arith.maximumf %28, %29 : vector<2x128xf32>
    %c4 = arith.constant 4 : index
    %c0_22 = arith.constant 0 : index
    %31 = vector.load %arg8[%c4, %c0_22] : memref<6x128xf32, #tpu.memory_space<vmem>>, vector<2x128xf32>
    tpu.vector_store %arg8[%c4, %c0_22], %30 {strides = array<i32>} : memref<6x128xf32, #tpu.memory_space<vmem>>, vector<2x128xf32>,
    %c0_23 = arith.constant 0 : index
    %c0_24 = arith.constant 0 : index
    %32 = vector.load %arg8[%c0_23, %c0_24] : memref<6x128xf32, #tpu.memory_space<vmem>>, vector<6x128xf32>
    %c0_25 = arith.constant 0 : index
    %c0_26 = arith.constant 0 : index
    %c0_27 = arith.constant 0 : index
    %33 = vector.load %arg3[%c0_25, %c0_26, %c0_27] : memref<9x128x128xf32, #tpu.memory_space<vmem>>, vector<1x128x128xf32>
    %34 = vector.shape_cast %33 : vector<1x128x128xf32> to vector<128x128xf32>
    %cst_28 = arith.constant dense<0.000000e+00> : vector<6x128xf32>
    %35 = tpu.matmul %32, %34, %cst_28 {dimension_numbers = #tpu.dot_dimension_numbers<[1], [0], [0], [1], [0, 0, 1, 1], [], []>} : vector<6x128xf32>, vector<128x128xf32>, vector<6x128xf32> -> vector<6x128xf32>
    %c0_29 = arith.constant 0 : index
    %c0_30 = arith.constant 0 : index
    %c0_31 = arith.constant 0 : index
    %36 = vector.load %arg4[%c0_29, %c0_30, %c0_31] : memref<9x56x28xf32, #tpu.memory_space<vmem>>, vector<1x56x28xf32>
    %37 = vector.shape_cast %36 : vector<1x56x28xf32> to vector<56x28xf32>
    %38 = vector.extract_strided_slice %37 {offsets = [0, 0], sizes = [14, 6], strides = [1, 1]} : vector<56x28xf32> to vector<14x6xf32>
    %cst_32 = arith.constant dense<0.000000e+00> : vector<14x128xf32>
    %39 = tpu.matmul %38, %35, %cst_32 {dimension_numbers = #tpu.dot_dimension_numbers<[1], [0], [0], [1], [0, 0, 1, 1], [], []>} : vector<14x6xf32>, vector<6x128xf32>, vector<14x128xf32> -> vector<14x128xf32>
    %c1_33 = arith.constant 1 : index
    %c0_34 = arith.constant 0 : index
    %c0_35 = arith.constant 0 : index
    %40 = vector.load %arg3[%c1_33, %c0_34, %c0_35] : memref<9x128x128xf32, #tpu.memory_space<vmem>>, vector<1x128x128xf32>
    %41 = vector.shape_cast %40 : vector<1x128x128xf32> to vector<128x128xf32>
    %cst_36 = arith.constant dense<0.000000e+00> : vector<6x128xf32>
    %42 = tpu.matmul %32, %41, %cst_36 {dimension_numbers = #tpu.dot_dimension_numbers<[1], [0], [0], [1], [0, 0, 1, 1], [], []>} : vector<6x128xf32>, vector<128x128xf32>, vector<6x128xf32> -> vector<6x128xf32>
    %c1_37 = arith.constant 1 : index
    %c0_38 = arith.constant 0 : index
    %c0_39 = arith.constant 0 : index
    %43 = vector.load %arg4[%c1_37, %c0_38, %c0_39] : memref<9x56x28xf32, #tpu.memory_space<vmem>>, vector<1x56x28xf32>
    %44 = vector.shape_cast %43 : vector<1x56x28xf32> to vector<56x28xf32>
    %45 = vector.extract_strided_slice %44 {offsets = [0, 0], sizes = [14, 6], strides = [1, 1]} : vector<56x28xf32> to vector<14x6xf32>
    %cst_40 = arith.constant dense<0.000000e+00> : vector<14x128xf32>
    %46 = tpu.matmul %45, %42, %cst_40 {dimension_numbers = #tpu.dot_dimension_numbers<[1], [0], [0], [1], [0, 0, 1, 1], [], []>} : vector<14x6xf32>, vector<6x128xf32>, vector<14x128xf32> -> vector<14x128xf32>
    %47 = arith.addf %39, %46 : vector<14x128xf32>
    %c2_41 = arith.constant 2 : index
    %c0_42 = arith.constant 0 : index
    %c0_43 = arith.constant 0 : index
    %48 = vector.load %arg3[%c2_41, %c0_42, %c0_43] : memref<9x128x128xf32, #tpu.memory_space<vmem>>, vector<1x128x128xf32>
    %49 = vector.shape_cast %48 : vector<1x128x128xf32> to vector<128x128xf32>
    %cst_44 = arith.constant dense<0.000000e+00> : vector<6x128xf32>
    %50 = tpu.matmul %32, %49, %cst_44 {dimension_numbers = #tpu.dot_dimension_numbers<[1], [0], [0], [1], [0, 0, 1, 1], [], []>} : vector<6x128xf32>, vector<128x128xf32>, vector<6x128xf32> -> vector<6x128xf32>
    %c2_45 = arith.constant 2 : index
    %c0_46 = arith.constant 0 : index
    %c0_47 = arith.constant 0 : index
    %51 = vector.load %arg4[%c2_45, %c0_46, %c0_47] : memref<9x56x28xf32, #tpu.memory_space<vmem>>, vector<1x56x28xf32>
    %52 = vector.shape_cast %51 : vector<1x56x28xf32> to vector<56x28xf32>
    %53 = vector.extract_strided_slice %52 {offsets = [0, 0], sizes = [14, 6], strides = [1, 1]} : vector<56x28xf32> to vector<14x6xf32>
    %cst_48 = arith.constant dense<0.000000e+00> : vector<14x128xf32>
    %54 = tpu.matmul %53, %50, %cst_48 {dimension_numbers = #tpu.dot_dimension_numbers<[1], [0], [0], [1], [0, 0, 1, 1], [], []>} : vector<14x6xf32>, vector<6x128xf32>, vector<14x128xf32> -> vector<14x128xf32>
    %55 = arith.addf %47, %54 : vector<14x128xf32>
    %c0_49 = arith.constant 0 : index
    %c0_50 = arith.constant 0 : index
    %c0_51 = arith.constant 0 : index
    %56 = vector.load %arg5[%c0_49, %c0_50, %c0_51] : memref<2x128x16xf32, #tpu.memory_space<vmem>>, vector<1x128x16xf32>
    %57 = vector.shape_cast %56 : vector<1x128x16xf32> to vector<128x16xf32>
    %c0_52 = arith.constant 0 : index
    %c0_53 = arith.constant 0 : index
    %c0_54 = arith.constant 0 : index
    %58 = vector.load %arg6[%c0_52, %c0_53, %c0_54] : memref<2x16x128xf32, #tpu.memory_space<vmem>>, vector<1x16x128xf32>
    %59 = vector.shape_cast %58 : vector<1x16x128xf32> to vector<16x128xf32>
    %cst_55 = arith.constant dense<0.000000e+00> : vector<128xf32>
    %60 = vector.multi_reduction <add>, %55, %cst_55 [0] : vector<14x128xf32> to vector<128xf32>
    %61 = vector.shape_cast %60 : vector<128xf32> to vector<1x128xf32>
    %62 = arith.mulf %55, %55 : vector<14x128xf32>
    %cst_56 = arith.constant dense<0.000000e+00> : vector<128xf32>
    %63 = vector.multi_reduction <add>, %62, %cst_56 [0] : vector<14x128xf32> to vector<128xf32>
    %64 = vector.shape_cast %63 : vector<128xf32> to vector<1x128xf32>
    %cst_57 = arith.constant dense<0.000000e+00> : vector<1x16xf32>
    %65 = tpu.matmul %61, %57, %cst_57 {dimension_numbers = #tpu.dot_dimension_numbers<[1], [0], [0], [1], [0, 0, 1, 1], [], []>} : vector<1x128xf32>, vector<128x16xf32>, vector<1x16xf32> -> vector<1x16xf32>
    %cst_58 = arith.constant 0.0102040814 : f32
    %66 = vector.broadcast %cst_58 : f32 to vector<1x16xf32>
    %67 = arith.mulf %65, %66 : vector<1x16xf32>
    %cst_59 = arith.constant dense<0.000000e+00> : vector<1x16xf32>
    %68 = tpu.matmul %64, %57, %cst_59 {dimension_numbers = #tpu.dot_dimension_numbers<[1], [0], [0], [1], [0, 0, 1, 1], [], []>} : vector<1x128xf32>, vector<128x16xf32>, vector<1x16xf32> -> vector<1x16xf32>
    %cst_60 = arith.constant 0.0102040814 : f32
    %69 = vector.broadcast %cst_60 : f32 to vector<1x16xf32>
    %70 = arith.mulf %68, %69 : vector<1x16xf32>
    %71 = arith.mulf %67, %67 : vector<1x16xf32>
    %72 = arith.subf %70, %71 : vector<1x16xf32>
    %cst_61 = arith.constant 9.99999974E-6 : f32
    %73 = vector.broadcast %cst_61 : f32 to vector<1x16xf32>
    %74 = arith.addf %72, %73 : vector<1x16xf32>
    %75 = math.rsqrt %74 : vector<1x16xf32>
    %cst_62 = arith.constant dense<0.000000e+00> : vector<1x128xf32>
    %76 = tpu.matmul %75, %59, %cst_62 {dimension_numbers = #tpu.dot_dimension_numbers<[1], [0], [0], [1], [0, 0, 1, 1], [], []>} : vector<1x16xf32>, vector<16x128xf32>, vector<1x128xf32> -> vector<1x128xf32>
    %77 = arith.mulf %67, %75 : vector<1x16xf32>
    %cst_63 = arith.constant dense<0.000000e+00> : vector<1x128xf32>
    %78 = tpu.matmul %77, %59, %cst_63 {dimension_numbers = #tpu.dot_dimension_numbers<[1], [0], [0], [1], [0, 0, 1, 1], [], []>} : vector<1x16xf32>, vector<16x128xf32>, vector<1x128xf32> -> vector<1x128xf32>
    %c4_64 = arith.constant 4 : index
    %c0_65 = arith.constant 0 : index
    %79 = vector.load %arg2[%c4_64, %c0_65] : memref<7x128xf32, #tpu.memory_space<vmem>>, vector<1x128xf32>
    %80 = vector.broadcast %76 : vector<1x128xf32> to vector<14x128xf32>
    %81 = arith.mulf %55, %80 : vector<14x128xf32>
    %82 = vector.broadcast %78 : vector<1x128xf32> to vector<14x128xf32>
    %83 = arith.subf %81, %82 : vector<14x128xf32>
    %84 = vector.broadcast %79 : vector<1x128xf32> to vector<14x128xf32>
    %85 = arith.addf %83, %84 : vector<14x128xf32>
    %cst_66 = arith.constant 0.000000e+00 : f32
    %86 = vector.broadcast %cst_66 : f32 to vector<14x128xf32>
    %87 = arith.maximumf %85, %86 : vector<14x128xf32>
    %c3_67 = arith.constant 3 : index
    %c0_68 = arith.constant 0 : index
    %c0_69 = arith.constant 0 : index
    %88 = vector.load %arg3[%c3_67, %c0_68, %c0_69] : memref<9x128x128xf32, #tpu.memory_space<vmem>>, vector<1x128x128xf32>
    %89 = vector.shape_cast %88 : vector<1x128x128xf32> to vector<128x128xf32>
    %cst_70 = arith.constant dense<0.000000e+00> : vector<14x128xf32>
    %90 = tpu.matmul %87, %89, %cst_70 {dimension_numbers = #tpu.dot_dimension_numbers<[1], [0], [0], [1], [0, 0, 1, 1], [], []>} : vector<14x128xf32>, vector<128x128xf32>, vector<14x128xf32> -> vector<14x128xf32>
    %c3_71 = arith.constant 3 : index
    %c0_72 = arith.constant 0 : index
    %c0_73 = arith.constant 0 : index
    %91 = vector.load %arg4[%c3_71, %c0_72, %c0_73] : memref<9x56x28xf32, #tpu.memory_space<vmem>>, vector<1x56x28xf32>
    %92 = vector.shape_cast %91 : vector<1x56x28xf32> to vector<56x28xf32>
    %93 = vector.extract_strided_slice %92 {offsets = [0, 0], sizes = [28, 14], strides = [1, 1]} : vector<56x28xf32> to vector<28x14xf32>
    %cst_74 = arith.constant dense<0.000000e+00> : vector<28x128xf32>
    %94 = tpu.matmul %93, %90, %cst_74 {dimension_numbers = #tpu.dot_dimension_numbers<[1], [0], [0], [1], [0, 0, 1, 1], [], []>} : vector<28x14xf32>, vector<14x128xf32>, vector<28x128xf32> -> vector<28x128xf32>
    %c4_75 = arith.constant 4 : index
    %c0_76 = arith.constant 0 : index
    %c0_77 = arith.constant 0 : index
    %95 = vector.load %arg3[%c4_75, %c0_76, %c0_77] : memref<9x128x128xf32, #tpu.memory_space<vmem>>, vector<1x128x128xf32>
    %96 = vector.shape_cast %95 : vector<1x128x128xf32> to vector<128x128xf32>
    %cst_78 = arith.constant dense<0.000000e+00> : vector<14x128xf32>
    %97 = tpu.matmul %87, %96, %cst_78 {dimension_numbers = #tpu.dot_dimension_numbers<[1], [0], [0], [1], [0, 0, 1, 1], [], []>} : vector<14x128xf32>, vector<128x128xf32>, vector<14x128xf32> -> vector<14x128xf32>
    %c4_79 = arith.constant 4 : index
    %c0_80 = arith.constant 0 : index
    %c0_81 = arith.constant 0 : index
    %98 = vector.load %arg4[%c4_79, %c0_80, %c0_81] : memref<9x56x28xf32, #tpu.memory_space<vmem>>, vector<1x56x28xf32>
    %99 = vector.shape_cast %98 : vector<1x56x28xf32> to vector<56x28xf32>
    %100 = vector.extract_strided_slice %99 {offsets = [0, 0], sizes = [28, 14], strides = [1, 1]} : vector<56x28xf32> to vector<28x14xf32>
    %cst_82 = arith.constant dense<0.000000e+00> : vector<28x128xf32>
    %101 = tpu.matmul %100, %97, %cst_82 {dimension_numbers = #tpu.dot_dimension_numbers<[1], [0], [0], [1], [0, 0, 1, 1], [], []>} : vector<28x14xf32>, vector<14x128xf32>, vector<28x128xf32> -> vector<28x128xf32>
    %102 = arith.addf %94, %101 : vector<28x128xf32>
    %c5 = arith.constant 5 : index
    %c0_83 = arith.constant 0 : index
    %c0_84 = arith.constant 0 : index
    %103 = vector.load %arg3[%c5, %c0_83, %c0_84] : memref<9x128x128xf32, #tpu.memory_space<vmem>>, vector<1x128x128xf32>
    %104 = vector.shape_cast %103 : vector<1x128x128xf32> to vector<128x128xf32>
    %cst_85 = arith.constant dense<0.000000e+00> : vector<14x128xf32>
    %105 = tpu.matmul %87, %104, %cst_85 {dimension_numbers = #tpu.dot_dimension_numbers<[1], [0], [0], [1], [0, 0, 1, 1], [], []>} : vector<14x128xf32>, vector<128x128xf32>, vector<14x128xf32> -> vector<14x128xf32>
    %c5_86 = arith.constant 5 : index
    %c0_87 = arith.constant 0 : index
    %c0_88 = arith.constant 0 : index
    %106 = vector.load %arg4[%c5_86, %c0_87, %c0_88] : memref<9x56x28xf32, #tpu.memory_space<vmem>>, vector<1x56x28xf32>
    %107 = vector.shape_cast %106 : vector<1x56x28xf32> to vector<56x28xf32>
    %108 = vector.extract_strided_slice %107 {offsets = [0, 0], sizes = [28, 14], strides = [1, 1]} : vector<56x28xf32> to vector<28x14xf32>
    %cst_89 = arith.constant dense<0.000000e+00> : vector<28x128xf32>
    %109 = tpu.matmul %108, %105, %cst_89 {dimension_numbers = #tpu.dot_dimension_numbers<[1], [0], [0], [1], [0, 0, 1, 1], [], []>} : vector<28x14xf32>, vector<14x128xf32>, vector<28x128xf32> -> vector<28x128xf32>
    %110 = arith.addf %102, %109 : vector<28x128xf32>
    %c1_90 = arith.constant 1 : index
    %c0_91 = arith.constant 0 : index
    %c0_92 = arith.constant 0 : index
    %111 = vector.load %arg5[%c1_90, %c0_91, %c0_92] : memref<2x128x16xf32, #tpu.memory_space<vmem>>, vector<1x128x16xf32>
    %112 = vector.shape_cast %111 : vector<1x128x16xf32> to vector<128x16xf32>
    %c1_93 = arith.constant 1 : index
    %c0_94 = arith.constant 0 : index
    %c0_95 = arith.constant 0 : index
    %113 = vector.load %arg6[%c1_93, %c0_94, %c0_95] : memref<2x16x128xf32, #tpu.memory_space<vmem>>, vector<1x16x128xf32>
    %114 = vector.shape_cast %113 : vector<1x16x128xf32> to vector<16x128xf32>
    %cst_96 = arith.constant dense<0.000000e+00> : vector<128xf32>
    %115 = vector.multi_reduction <add>, %110, %cst_96 [0] : vector<28x128xf32> to vector<128xf32>
    %116 = vector.shape_cast %115 : vector<128xf32> to vector<1x128xf32>
    %117 = arith.mulf %110, %110 : vector<28x128xf32>
    %cst_97 = arith.constant dense<0.000000e+00> : vector<128xf32>
    %118 = vector.multi_reduction <add>, %117, %cst_97 [0] : vector<28x128xf32> to vector<128xf32>
    %119 = vector.shape_cast %118 : vector<128xf32> to vector<1x128xf32>
    %cst_98 = arith.constant dense<0.000000e+00> : vector<1x16xf32>
    %120 = tpu.matmul %116, %112, %cst_98 {dimension_numbers = #tpu.dot_dimension_numbers<[1], [0], [0], [1], [0, 0, 1, 1], [], []>} : vector<1x128xf32>, vector<128x16xf32>, vector<1x16xf32> -> vector<1x16xf32>
    %cst_99 = arith.constant 0.00255102036 : f32
    %121 = vector.broadcast %cst_99 : f32 to vector<1x16xf32>
    %122 = arith.mulf %120, %121 : vector<1x16xf32>
    %cst_100 = arith.constant dense<0.000000e+00> : vector<1x16xf32>
    %123 = tpu.matmul %119, %112, %cst_100 {dimension_numbers = #tpu.dot_dimension_numbers<[1], [0], [0], [1], [0, 0, 1, 1], [], []>} : vector<1x128xf32>, vector<128x16xf32>, vector<1x16xf32> -> vector<1x16xf32>
    %cst_101 = arith.constant 0.00255102036 : f32
    %124 = vector.broadcast %cst_101 : f32 to vector<1x16xf32>
    %125 = arith.mulf %123, %124 : vector<1x16xf32>
    %126 = arith.mulf %122, %122 : vector<1x16xf32>
    %127 = arith.subf %125, %126 : vector<1x16xf32>
    %cst_102 = arith.constant 9.99999974E-6 : f32
    %128 = vector.broadcast %cst_102 : f32 to vector<1x16xf32>
    %129 = arith.addf %127, %128 : vector<1x16xf32>
    %130 = math.rsqrt %129 : vector<1x16xf32>
    %cst_103 = arith.constant dense<0.000000e+00> : vector<1x128xf32>
    %131 = tpu.matmul %130, %114, %cst_103 {dimension_numbers = #tpu.dot_dimension_numbers<[1], [0], [0], [1], [0, 0, 1, 1], [], []>} : vector<1x16xf32>, vector<16x128xf32>, vector<1x128xf32> -> vector<1x128xf32>
    %132 = arith.mulf %122, %130 : vector<1x16xf32>
    %cst_104 = arith.constant dense<0.000000e+00> : vector<1x128xf32>
    %133 = tpu.matmul %132, %114, %cst_104 {dimension_numbers = #tpu.dot_dimension_numbers<[1], [0], [0], [1], [0, 0, 1, 1], [], []>} : vector<1x16xf32>, vector<16x128xf32>, vector<1x128xf32> -> vector<1x128xf32>
    %c5_105 = arith.constant 5 : index
    %c0_106 = arith.constant 0 : index
    %134 = vector.load %arg2[%c5_105, %c0_106] : memref<7x128xf32, #tpu.memory_space<vmem>>, vector<1x128xf32>
    %135 = vector.broadcast %131 : vector<1x128xf32> to vector<28x128xf32>
    %136 = arith.mulf %110, %135 : vector<28x128xf32>
    %137 = vector.broadcast %133 : vector<1x128xf32> to vector<28x128xf32>
    %138 = arith.subf %136, %137 : vector<28x128xf32>
    %139 = vector.broadcast %134 : vector<1x128xf32> to vector<28x128xf32>
    %140 = arith.addf %138, %139 : vector<28x128xf32>
    %cst_107 = arith.constant 0.000000e+00 : f32
    %141 = vector.broadcast %cst_107 : f32 to vector<28x128xf32>
    %142 = arith.maximumf %140, %141 : vector<28x128xf32>
    %c6 = arith.constant 6 : index
    %c0_108 = arith.constant 0 : index
    %c0_109 = arith.constant 0 : index
    %143 = vector.load %arg3[%c6, %c0_108, %c0_109] : memref<9x128x128xf32, #tpu.memory_space<vmem>>, vector<1x128x128xf32>
    %144 = vector.shape_cast %143 : vector<1x128x128xf32> to vector<128x128xf32>
    %cst_110 = arith.constant dense<0.000000e+00> : vector<28x128xf32>
    %145 = tpu.matmul %142, %144, %cst_110 {dimension_numbers = #tpu.dot_dimension_numbers<[1], [0], [0], [1], [0, 0, 1, 1], [], []>} : vector<28x128xf32>, vector<128x128xf32>, vector<28x128xf32> -> vector<28x128xf32>
    %c6_111 = arith.constant 6 : index
    %c0_112 = arith.constant 0 : index
    %c0_113 = arith.constant 0 : index
    %146 = vector.load %arg4[%c6_111, %c0_112, %c0_113] : memref<9x56x28xf32, #tpu.memory_space<vmem>>, vector<1x56x28xf32>
    %147 = vector.shape_cast %146 : vector<1x56x28xf32> to vector<56x28xf32>
    %cst_114 = arith.constant dense<0.000000e+00> : vector<56x128xf32>
    %148 = tpu.matmul %147, %145, %cst_114 {dimension_numbers = #tpu.dot_dimension_numbers<[1], [0], [0], [1], [0, 0, 1, 1], [], []>} : vector<56x28xf32>, vector<28x128xf32>, vector<56x128xf32> -> vector<56x128xf32>
    %c7 = arith.constant 7 : index
    %c0_115 = arith.constant 0 : index
    %c0_116 = arith.constant 0 : index
    %149 = vector.load %arg3[%c7, %c0_115, %c0_116] : memref<9x128x128xf32, #tpu.memory_space<vmem>>, vector<1x128x128xf32>
    %150 = vector.shape_cast %149 : vector<1x128x128xf32> to vector<128x128xf32>
    %cst_117 = arith.constant dense<0.000000e+00> : vector<28x128xf32>
    %151 = tpu.matmul %142, %150, %cst_117 {dimension_numbers = #tpu.dot_dimension_numbers<[1], [0], [0], [1], [0, 0, 1, 1], [], []>} : vector<28x128xf32>, vector<128x128xf32>, vector<28x128xf32> -> vector<28x128xf32>
    %c7_118 = arith.constant 7 : index
    %c0_119 = arith.constant 0 : index
    %c0_120 = arith.constant 0 : index
    %152 = vector.load %arg4[%c7_118, %c0_119, %c0_120] : memref<9x56x28xf32, #tpu.memory_space<vmem>>, vector<1x56x28xf32>
    %153 = vector.shape_cast %152 : vector<1x56x28xf32> to vector<56x28xf32>
    %cst_121 = arith.constant dense<0.000000e+00> : vector<56x128xf32>
    %154 = tpu.matmul %153, %151, %cst_121 {dimension_numbers = #tpu.dot_dimension_numbers<[1], [0], [0], [1], [0, 0, 1, 1], [], []>} : vector<56x28xf32>, vector<28x128xf32>, vector<56x128xf32> -> vector<56x128xf32>
    %155 = arith.addf %148, %154 : vector<56x128xf32>
    %c8 = arith.constant 8 : index
    %c0_122 = arith.constant 0 : index
    %c0_123 = arith.constant 0 : index
    %156 = vector.load %arg3[%c8, %c0_122, %c0_123] : memref<9x128x128xf32, #tpu.memory_space<vmem>>, vector<1x128x128xf32>
    %157 = vector.shape_cast %156 : vector<1x128x128xf32> to vector<128x128xf32>
    %cst_124 = arith.constant dense<0.000000e+00> : vector<28x128xf32>
    %158 = tpu.matmul %142, %157, %cst_124 {dimension_numbers = #tpu.dot_dimension_numbers<[1], [0], [0], [1], [0, 0, 1, 1], [], []>} : vector<28x128xf32>, vector<128x128xf32>, vector<28x128xf32> -> vector<28x128xf32>
    %c8_125 = arith.constant 8 : index
    %c0_126 = arith.constant 0 : index
    %c0_127 = arith.constant 0 : index
    %159 = vector.load %arg4[%c8_125, %c0_126, %c0_127] : memref<9x56x28xf32, #tpu.memory_space<vmem>>, vector<1x56x28xf32>
    %160 = vector.shape_cast %159 : vector<1x56x28xf32> to vector<56x28xf32>
    %cst_128 = arith.constant dense<0.000000e+00> : vector<56x128xf32>
    %161 = tpu.matmul %160, %158, %cst_128 {dimension_numbers = #tpu.dot_dimension_numbers<[1], [0], [0], [1], [0, 0, 1, 1], [], []>} : vector<56x28xf32>, vector<28x128xf32>, vector<56x128xf32> -> vector<56x128xf32>
    %162 = arith.addf %155, %161 : vector<56x128xf32>
    %c6_129 = arith.constant 6 : index
    %c0_130 = arith.constant 0 : index
    %163 = vector.load %arg2[%c6_129, %c0_130] : memref<7x128xf32, #tpu.memory_space<vmem>>, vector<1x128xf32>
    %164 = vector.broadcast %163 : vector<1x128xf32> to vector<56x128xf32>
    %165 = arith.addf %162, %164 : vector<56x128xf32>
    %166 = arith.negf %165 : vector<56x128xf32>
    %167 = math.exp %166 : vector<56x128xf32>
    %cst_131 = arith.constant 1.000000e+00 : f32
    %168 = vector.broadcast %cst_131 : f32 to vector<56x128xf32>
    %169 = arith.addf %168, %167 : vector<56x128xf32>
    %170 = arith.divf %168, %169 : vector<56x128xf32>
    %c0_132 = arith.constant 0 : index
    %c0_133 = arith.constant 0 : index
    %171 = vector.load %arg7[%c0_132, %c0_133] : memref<56x128xf32, #tpu.memory_space<vmem>>, vector<56x128xf32>
    tpu.vector_store %arg7[%c0_132, %c0_133], %170 {strides = array<i32>} : memref<56x128xf32, #tpu.memory_space<vmem>>, vector<56x128xf32>,
    return
  }
}

</mosaic_0001>

<bundles_post_ra>
// kernel: decoder_forward.1
= control target key start
LH: loop header
LB: loop body
LE: loop exit
PB: predicated region body
PF: predicated region fallthrough
CT: control target
= control target key end

     0   :  { %12 = vsyncpa [#allocation4], 0  ;;  %s4796_s24 = smov [#allocation3]   ;;  %s5597_s0 = inlined_call_operand.vmem [shape: f32[2,4], index: 0, kind: input, shape index: {}]   ;;  %s5598_s1 = inlined_call_operand.vmem [shape: f32[388,128], index: 1, kind: input, shape index: {}]   ;;  %s5599_s2 = inlined_call_operand.vmem [shape: f32[7,128], index: 2, kind: input, shape index: {}]   ;;  %s5600_s3 = inlined_call_operand.hbm [shape: f32[9,128,128], index: 3, kind: input, shape index: {}]   ;;  %s5601_s4 = inlined_call_operand.vmem [shape: f32[9,56,28], index: 4, kind: input, shape index: {}]   ;;  %s5602_s5 = inlined_call_operand.vmem [shape: f32[2,128,16], index: 5, kind: input, shape index: {}]   ;;  %s5603_s6 = inlined_call_operand.vmem [shape: f32[2,16,128], index: 6, kind: input, shape index: {}]   ;;  %s5604_s7 = inlined_call_operand.vmem [shape: f32[56,128], index: 7, kind: output, shape index: {}]  }
   0x1   :  { %s24_s25 = sshll.u32 %s4796_s24, 4  ;;  %s4772_s28 = scalar_lea.hbm %s5600_s3, 18432  ;;  %s25_s25 = int_to_ptr.vmem [resolvable:$true] %s24_s25 }
   0x2   :  { %p4773_p0 = scmp.ne.s32.totalorder %s5600_s3, %s4772_s28  ;;  %p4776_p1 = scmp.lt.u32.totalorder %s4772_s28, %s5600_s3 }
   0x4   :  { %p4778_p2 = pnand %p4776_p1, %p4773_p0 }
   0x6   :  { %4781 = shalt.err (!%p4778_p2)
}
   0x7   :  { %s4782_s10 = scalar_lea.vmem %s25_s25, 18432  ;;  %p4787_p4 = scmp.lt.s32.totalorder %s25_s25, %s25_s25 }
   0x8   :  { %p4783_p3 = scmp.ne.s32.totalorder %s25_s25, %s4782_s10  ;;  %p4788_p5 = scmp.lt.s32.totalorder %s4782_s10, %s4782_s10 }
   0xa   :  { %p4789_p6 = por %p4788_p5, %p4787_p4 }
   0xc   :  { %p4790_p7 = pnand %p4789_p6, %p4783_p3 }
   0xe   :  { %4793 = shalt.err (!%p4790_p7)
}
   0xf   :  { %s4797_s11 = smov 128   ;;  %s4798_s12 = smov 8  }
  0x10   :  { %30 = dma.hbm_to_vmem [thread:$0]  %s5600_s3, 18432, %s25_s25, [#allocation4], %s4797_s11, %s4797_s11, %s4798_s12  }
  0x11   :  { %4794 = dma.done.wait [#allocation4], 18432  }
  0x12   :  { %4795 = vsyncadd [#allocation4], 4294948864  ;;  %v4799_v0 = vmov 0.0   ;;  %vm4800_vm0 = vmmov 0   ;;  %v4801_v1 = vmov 0.0|0.0   ;;  %vm51_vm1 = vcmask 1043456  }
  0x13   :  { %3500 = vmatprep.subr.mxu0 %v4799_v0  ;;  %3502 = vmatprep.mubr.msk.f32.mxu0 %vm4800_vm0, %v4799_v0  ;;  %vm47_vm2 = vcmask 31744   ;;  %v40_v2 = vld [vmem:[%s5598_s1 + $0x180] sm:$0xf]  ;;  %v127_v5 = vld [vmem:[%s5598_s1 + $0x8] sm:$0xff]  ;;  %v128_v10 = vld [vmem:[%s5598_s1 + $0x10] sm:$0xff]  ;;  %vm584_vm3 = vcmask 48128  }
  0x14   :  { %4234 = vmatprep.subr.bf16.mxu1 %v4801_v1  ;;  %3537 = vmatprep.mubr.msk.f32.mxu1 %vm4800_vm0, %v4799_v0  ;;  %v41_v3 = vld [vmem:[%s5597_s0] sm:$0x3]  ;;  %v220_v7 = vld [vmem:[%s5598_s1 + $0x88] sm:$0xff]  ;;  %v129_v11 = vld [vmem:[%s5598_s1 + $0x18] sm:$0xff]  ;;  %vm591_vm4 = vcmask 1045504   ;;  %vm1112_vm5 = vcmask 130048  }
  0x15   :  { %v126_v4 = vld [vmem:[%s5598_s1] sm:$0xff]  ;;  %3501 = vmatpush3.msk.msra.mxu0 %vm51_vm1, %v40_v2  ;;  %v221_v12 = vld [vmem:[%s5598_s1 + $0x90] sm:$0xff]  ;;  %v222_v13 = vld [vmem:[%s5598_s1 + $0x98] sm:$0xff]  ;;  %v4238_v14 = vpack.c.bf16 %v129_v11, %v128_v10  ;;  %vm1475_vm6 = vcmask 113664   ;;  %vm4802_vm7 = vmmov 1   ;;  %vm2463_vm10 = vcmask 228352  }
  0x16   :  { %v219_v6 = vld [vmem:[%s5598_s1 + $0x80] sm:$0xff]  ;;  %3503 = vmatmul.mubr.msk.f32.vlgmr.msra.gmra.mrb[0].mxu0 %vm47_vm2, %v41_v3  ;;  %v4235_v8 = vpack.c.bf16 %v127_v5, %v126_v4  ;;  %4258 = vmatprep.subr.bf16.mxu0 %v4801_v1  ;;  %v4262_v15 = vpack.c.bf16 %v222_v13, %v221_v12  ;;  %v131_v17 = vld [vmem:[%s5598_s1 + $0x28] sm:$0xff]  ;;  %v132_v22 = vld [vmem:[%s5598_s1 + $0x30] sm:$0xff] }
  0x17   :  { %v4259_v9 = vpack.c.bf16 %v220_v7, %v219_v6  ;;  %3572 = vmatprep.mubr.msk.f32.mxu0 %vm4800_vm0, %v4799_v0  ;;  %v130_v16 = vld [vmem:[%s5598_s1 + $0x20] sm:$0xff]  ;;  %v224_v19 = vld [vmem:[%s5598_s1 + $0xa8] sm:$0xff]  ;;  %v133_v23 = vld [vmem:[%s5598_s1 + $0x38] sm:$0xff] }
  0x18   :  { %4236 = vmatpush3.bf16.msra.mxu1 %v4235_v8  ;;  %v223_v18 = vld [vmem:[%s5598_s1 + $0xa0] sm:$0xff]  ;;  %v4241_v20 = vpack.c.bf16 %v131_v17, %v130_v16  ;;  %v225_v24 = vld [vmem:[%s5598_s1 + $0xb0] sm:$0xff]  ;;  %v226_v25 = vld [vmem:[%s5598_s1 + $0xb8] sm:$0xff]  ;;  %v4244_v26 = vpack.c.bf16 %v133_v23, %v132_v22 }
  0x19   :  { %4260 = vmatpush3.bf16.msra.mxu0 %v4259_v9  ;;  %4237 = vmatprep.subr.bf16.mxu1 %v4801_v1  ;;  %v4265_v21 = vpack.c.bf16 %v224_v19, %v223_v18  ;;  %v4268_v27 = vpack.c.bf16 %v226_v25, %v225_v24  ;;  %v134_v28 = vld [vmem:[%s5598_s1 + $0x40] sm:$0xff]  ;;  %v135_v29 = vld [vmem:[%s5598_s1 + $0x48] sm:$0xff]  ;;  %v136_v34 = vld [vmem:[%s5598_s1 + $0x50] sm:$0xff] }
  0x1a   :  { %4261 = vmatprep.subr.bf16.mxu0 %v4801_v1  ;;  %v227_v30 = vld [vmem:[%s5598_s1 + $0xc0] sm:$0xff]  ;;  %v228_v31 = vld [vmem:[%s5598_s1 + $0xc8] sm:$0xff]  ;;  %v4247_v32 = vpack.c.bf16 %v135_v29, %v134_v28  ;;  %v137_v35 = vld [vmem:[%s5598_s1 + $0x58] sm:$0xff] }
  0x1b   :  { %v4271_v33 = vpack.c.bf16 %v228_v31, %v227_v30  ;;  %v229_v36 = vld [vmem:[%s5598_s1 + $0xd0] sm:$0xff]  ;;  %v230_v37 = vld [vmem:[%s5598_s1 + $0xd8] sm:$0xff]  ;;  %v4250_v38 = vpack.c.bf16 %v137_v35, %v136_v34  ;;  %v138_v40 = vld [vmem:[%s5598_s1 + $0x60] sm:$0xff] }
  0x1c   :  { %4239 = vmatpush3.bf16.msra.mxu1 %v4238_v14  ;;  %v4274_v39 = vpack.c.bf16 %v230_v37, %v229_v36  ;;  %v139_v41 = vld [vmem:[%s5598_s1 + $0x68] sm:$0xff]  ;;  %v231_v42 = vld [vmem:[%s5598_s1 + $0xe0] sm:$0xff]  ;;  %v140_v46 = vld [vmem:[%s5598_s1 + $0x70] sm:$0xff] }
  0x1d   :  { %4263 = vmatpush3.bf16.msra.mxu0 %v4262_v15  ;;  %4240 = vmatprep.subr.bf16.mxu1 %v4801_v1  ;;  %v232_v43 = vld [vmem:[%s5598_s1 + $0xe8] sm:$0xff]  ;;  %v4253_v44 = vpack.c.bf16 %v139_v41, %v138_v40  ;;  %v141_v47 = vld [vmem:[%s5598_s1 + $0x78] sm:$0xff]  ;;  %v233_v49 = vld [vmem:[%s5598_s1 + $0xf0] sm:$0xff] }
  0x1e   :  { %4264 = vmatprep.subr.bf16.mxu0 %v4801_v1  ;;  %v4277_v45 = vpack.c.bf16 %v232_v43, %v231_v42  ;;  %v4256_v48 = vpack.c.bf16 %v141_v47, %v140_v46  ;;  %v234_v50 = vld [vmem:[%s5598_s1 + $0xf8] sm:$0xff]  ;;  %v3019_v52 = vld [vmem:[%s5599_s2] ss:$0 sm:$0xff]  ;;  %v313_v54 = vld [vmem:[%s5598_s1 + $0x108] sm:$0xff] }
  0x1f   :  { %v4280_v51 = vpack.c.bf16 %v234_v50, %v233_v49  ;;  %v312_v53 = vld [vmem:[%s5598_s1 + $0x100] sm:$0xff]  ;;  %v314_v60 = vld [vmem:[%s5598_s1 + $0x110] sm:$0xff]  ;;  %v315_v61 = vld [vmem:[%s5598_s1 + $0x118] sm:$0xff] }
  0x20   :  { %4242 = vmatpush3.bf16.msra.mxu1 %v4241_v20  ;;  %v4283_v58 = vpack.c.bf16 %v313_v54, %v312_v53  ;;  %v4286_v62 = vpack.c.bf16 %v315_v61, %v314_v60  ;;  %v316_v63 = vld [vmem:[%s5598_s1 + $0x120] sm:$0xff]  ;;  %v317_v2 = vld [vmem:[%s5598_s1 + $0x128] sm:$0xff]  ;;  %v318_v4 = vld [vmem:[%s5598_s1 + $0x130] sm:$0xff] }
  0x21   :  { %4266 = vmatpush3.bf16.msra.mxu0 %v4265_v21  ;;  %4243 = vmatprep.subr.bf16.mxu1 %v4801_v1  ;;  %v4289_v3 = vpack.c.bf16 %v317_v2, %v316_v63  ;;  %v319_v5 = vld [vmem:[%s5598_s1 + $0x138] sm:$0xff]  ;;  %v320_v7 = vld [vmem:[%s5598_s1 + $0x140] sm:$0xff]  ;;  %v321_v8 = vld [vmem:[%s5598_s1 + $0x148] sm:$0xff] }
  0x22   :  { %4267 = vmatprep.subr.bf16.mxu0 %v4801_v1  ;;  %v4292_v6 = vpack.c.bf16 %v319_v5, %v318_v4  ;;  %v4295_v9 = vpack.c.bf16 %v321_v8, %v320_v7  ;;  %v322_v10 = vld [vmem:[%s5598_s1 + $0x150] sm:$0xff]  ;;  %v323_v11 = vld [vmem:[%s5598_s1 + $0x158] sm:$0xff]  ;;  %v324_v13 = vld [vmem:[%s5598_s1 + $0x160] sm:$0xff] }
  0x23   :  { %v4298_v12 = vpack.c.bf16 %v323_v11, %v322_v10  ;;  %v325_v14 = vld [vmem:[%s5598_s1 + $0x168] sm:$0xff]  ;;  %v326_v16 = vld [vmem:[%s5598_s1 + $0x170] sm:$0xff]  ;;  %v327_v17 = vld [vmem:[%s5598_s1 + $0x178] sm:$0xff] }
  0x24   :  { %4245 = vmatpush3.bf16.msra.mxu1 %v4244_v26  ;;  %v4301_v15 = vpack.c.bf16 %v325_v14, %v324_v13  ;;  %v4304_v18 = vpack.c.bf16 %v327_v17, %v326_v16  ;;  %v406_v19 = vld [vmem:[#allocation3] sm:$0xff]  ;;  %v407_v20 = vld [vmem:[#allocation3 + $0x8] sm:$0xff]  ;;  %v408_v24 = vld [vmem:[#allocation3 + $0x10] sm:$0xff] }
  0x25   :  { %4269 = vmatpush3.bf16.msra.mxu0 %v4268_v27  ;;  %4246 = vmatprep.subr.bf16.mxu1 %v4801_v1  ;;  %v495_v21 = vld [vmem:[#allocation3 + $0x80] sm:$0xff]  ;;  %v4307_v22 = vpack.c.bf16 %v407_v20, %v406_v19  ;;  %v496_v23 = vld [vmem:[#allocation3 + $0x88] sm:$0xff]  ;;  %v409_v25 = vld [vmem:[#allocation3 + $0x18] sm:$0xff] }
  0x26   :  { %4270 = vmatprep.subr.bf16.mxu0 %v4801_v1  ;;  %v4331_v26 = vpack.c.bf16 %v496_v23, %v495_v21  ;;  %v497_v27 = vld [vmem:[#allocation3 + $0x90] sm:$0xff]  ;;  %v498_v28 = vld [vmem:[#allocation3 + $0x98] sm:$0xff]  ;;  %v4310_v29 = vpack.c.bf16 %v409_v25, %v408_v24  ;;  %v410_v31 = vld [vmem:[#allocation3 + $0x20] sm:$0xff] }
  0x27   :  { %v4334_v30 = vpack.c.bf16 %v498_v28, %v497_v27  ;;  %v500_v34 = vld [vmem:[#allocation3 + $0xa8] sm:$0xff]  ;;  %v412_v37 = vld [vmem:[#allocation3 + $0x30] sm:$0xff]  ;;  %v502_v40 = vld [vmem:[#allocation3 + $0xb8] sm:$0xff] }
  0x28   :  { %4248 = vmatpush3.bf16.msra.mxu1 %v4247_v32  ;;  %v411_v32 = vld [vmem:[#allocation3 + $0x28] sm:$0xff]  ;;  %v414_v43 = vld [vmem:[#allocation3 + $0x40] sm:$0xff]  ;;  %v416_v49 = vld [vmem:[#allocation3 + $0x50] sm:$0xff] }
  0x29   :  { %4272 = vmatpush3.bf16.msra.mxu0 %v4271_v33  ;;  %4249 = vmatprep.subr.bf16.mxu1 %v4801_v1  ;;  %v499_v33 = vld [vmem:[#allocation3 + $0xa0] sm:$0xff]  ;;  %v4313_v35 = vpack.c.bf16 %v411_v32, %v410_v31  ;;  %v504_v46 = vld [vmem:[#allocation3 + $0xc8] sm:$0xff]  ;;  %v417_v50 = vld [vmem:[#allocation3 + $0x58] sm:$0xff] }
  0x2a   :  { %4273 = vmatprep.subr.bf16.mxu0 %v4801_v1  ;;  %v4337_v36 = vpack.c.bf16 %v500_v34, %v499_v33  ;;  %v506_v53 = vld [vmem:[#allocation3 + $0xd8] sm:$0xff]  ;;  %v420_v61 = vld [vmem:[#allocation3 + $0x70] sm:$0xff]  ;;  %v755_v28 = vld [vmem:[#allocation3 + $0x100] sm:$0xff] }
  0x2b   :  { %v509_v63 = vld [vmem:[#allocation3 + $0xf0] sm:$0xff]  ;;  %v3022_v5 = vld [vmem:[%s5599_s2 + $0x1] ss:$0 sm:$0xff]  ;;  %vm5244_vm8 = vmpackc.low %vm591_vm4, %vm4802_vm7 }
  0x2c   :  { %4251 = vmatpush3.bf16.msra.mxu1 %v4250_v38  ;;  %v413_v38 = vld [vmem:[#allocation3 + $0x38] sm:$0xff]  ;;  %v3025_v21 = vld [vmem:[%s5601_s4 + $0x38] sm:$0xff]  ;;  %vm5419_vm9 = vmpackc.low %vm51_vm1, %vm4802_vm7 }
  0x2d   :  { %4275 = vmatpush3.bf16.msra.mxu0 %v4274_v39  ;;  %4252 = vmatprep.subr.bf16.mxu1 %v4801_v1  ;;  %v501_v39 = vld [vmem:[#allocation3 + $0xb0] sm:$0xff]  ;;  %v4316_v41 = vpack.c.bf16 %v413_v38, %v412_v37  ;;  %v3026_v24 = vld [vmem:[%s5601_s4 + $0x40] sm:$0xff] }
  0x2e   :  { %4276 = vmatprep.subr.bf16.mxu0 %v4801_v1  ;;  %v4340_v42 = vpack.c.bf16 %v502_v40, %v501_v39  ;;  %v492_v27 = vld [vmem:[%s5601_s4] sm:$0xff]  ;;  %v757_v32 = vld [vmem:[#allocation3 + $0x110] sm:$0xff] }
  0x2f   :  { %v758_v33 = vld [vmem:[#allocation3 + $0x118] sm:$0xff]  ;;  %v761_v38 = vld [vmem:[#allocation3 + $0x130] sm:$0xff] }
  0x30   :  { %4254 = vmatpush3.bf16.msra.mxu1 %v4253_v44  ;;  %v415_v44 = vld [vmem:[#allocation3 + $0x48] sm:$0xff]  ;;  %v4358_v34 = vpack.c.bf16 %v758_v33, %v757_v32  ;;  %v762_v39 = vld [vmem:[#allocation3 + $0x138] sm:$0xff] }
  0x31   :  { %4278 = vmatpush3.bf16.msra.mxu0 %v4277_v45  ;;  %4255 = vmatprep.subr.bf16.mxu1 %v4801_v1  ;;  %v503_v45 = vld [vmem:[#allocation3 + $0xc0] sm:$0xff]  ;;  %v4319_v47 = vpack.c.bf16 %v415_v44, %v414_v43  ;;  %v4364_v40 = vpack.c.bf16 %v762_v39, %v761_v38  ;;  %v765_v44 = vld [vmem:[#allocation3 + $0x150] sm:$0xff]  ;;  %v946_v39 = vld [vmem:[%s5603_s6] sm:$0xff] }
  0x32   :  { %4279 = vmatprep.subr.bf16.mxu0 %v4801_v1 }
  0x34   :  { %4257 = vmatpush3.bf16.msra.mxu1 %v4256_v48  ;;  %v4343_v48 = vpack.c.bf16 %v504_v46, %v503_v45  ;;  %v766_v45 = vld [vmem:[#allocation3 + $0x158] sm:$0xff] }
  0x35   :  { %4281 = vmatpush3.bf16.msra.mxu0 %v4280_v51  ;;  %4282 = vmatprep.subr.bf16.mxu1 %v4801_v1  ;;  %v505_v51 = vld [vmem:[#allocation3 + $0xd0] sm:$0xff]  ;;  %v4370_v46 = vpack.c.bf16 %v766_v45, %v765_v44 }
  0x36   :  { %4306 = vmatprep.subr.bf16.mxu0 %v4801_v1  ;;  %v4346_v54 = vpack.c.bf16 %v506_v53, %v505_v51  ;;  %v770_v51 = vld [vmem:[#allocation3 + $0x178] sm:$0xff]  ;;  %v3033_v53 = vld [vmem:[%s5601_s4 + $0x70] sm:$0xff]  ;;  %v1381_v45 = vld [vmem:[#allocation3 + $0x210] sm:$0xff] }
  0xe9   :  { %v121_v55 = vpop.f32.mrb[0].mxu0 }
  0xea   :  { %v122_v56 = vadd.f32 %v3019_v52, %v121_v55  ;;  %v3504_v57 = vpop.f32.mrb[1].mxu0  ;;  %v4322_v52 = vpack.c.bf16 %v417_v50, %v416_v49  ;;  %v418_v55 = vld [vmem:[#allocation3 + $0x60] sm:$0xff]  ;;  %v769_v50 = vld [vmem:[#allocation3 + $0x170] sm:$0xff] }
  0xeb   :  { %v507_v57 = vld [vmem:[#allocation3 + $0xe0] sm:$0xff] }
  0xec   :  { %v125_v59 = vmax.f32 %v122_v56, 0.0  ;;  %v419_v56 = vld [vmem:[#allocation3 + $0x68] sm:$0xff] }
  0xee   :  { %3538 = vmatmul.mubr.f32.vlgmr.msra.gmra.mrb[0].mxu1 %v125_v59  ;;  %3573 = vmatmul.mubr.f32.vlgmr.msra.gmra.mrb[2].mxu0 %v125_v59 }
  0xef   :  { %4284 = vmatpush3.bf16.msra.mxu1 %v4283_v58  ;;  %3607 = vmatprep.mubr.msk.f32.mxu1 %vm4800_vm0, %v4799_v0  ;;  %v4325_v58 = vpack.c.bf16 %v419_v56, %v418_v55  ;;  %v931_v55 = vld [vmem:[%s5602_s5 + $0x8] sm:$0xff] }
  0xf0   :  { %4285 = vmatprep.subr.bf16.mxu1 %v4801_v1  ;;  %3642 = vmatprep.mubr.msk.f32.mxu0 %vm4800_vm0, %v4799_v0 }
  0xf1   :  { %4308 = vmatpush3.bf16.msra.mxu0 %v4307_v22 }
  0xf2   :  { %4309 = vmatprep.subr.bf16.mxu0 %v4801_v1 }
  0xf3   :  { %4287 = vmatpush3.bf16.msra.mxu1 %v4286_v62  ;;  %v421_v62 = vld [vmem:[#allocation3 + $0x78] sm:$0xff] }
  0xf4   :  { %4288 = vmatprep.subr.bf16.mxu1 %v4801_v1  ;;  %v4328_v2 = vpack.c.bf16 %v421_v62, %v420_v61  ;;  %v935_v61 = vld [vmem:[%s5602_s5 + $0x28] sm:$0xff] }
  0xf5   :  { %4311 = vmatpush3.bf16.msra.mxu0 %v4310_v29  ;;  %v756_v29 = vld [vmem:[#allocation3 + $0x108] sm:$0xff] }
  0xf6   :  { %4312 = vmatprep.subr.bf16.mxu0 %v4801_v1  ;;  %v4355_v31 = vpack.c.bf16 %v756_v29, %v755_v28 }
  0xf7   :  { %4290 = vmatpush3.bf16.msra.mxu1 %v4289_v3  ;;  %v510_v3 = vld [vmem:[#allocation3 + $0xf8] sm:$0xff] }
  0xf8   :  { %4291 = vmatprep.subr.bf16.mxu1 %v4801_v1  ;;  %v4352_v4 = vpack.c.bf16 %v510_v3, %v509_v63  ;;  %v936_v63 = vld [vmem:[%s5602_s5 + $0x30] sm:$0xff] }
  0xf9   :  { %4314 = vmatpush3.bf16.msra.mxu0 %v4313_v35  ;;  %v759_v35 = vld [vmem:[#allocation3 + $0x120] sm:$0xff] }
  0xfa   :  { %4315 = vmatprep.subr.bf16.mxu0 %v4801_v1 }
  0xfb   :  { %4293 = vmatpush3.bf16.msra.mxu1 %v4292_v6  ;;  %v3023_v6 = vld [vmem:[%s5599_s2 + $0x2] ss:$0 sm:$0xff] }
  0xfc   :  { %4294 = vmatprep.subr.bf16.mxu1 %v4801_v1 }
  0xfd   :  { %4317 = vmatpush3.bf16.msra.mxu0 %v4316_v41  ;;  %v763_v41 = vld [vmem:[#allocation3 + $0x140] sm:$0xff] }
  0xfe   :  { %4318 = vmatprep.subr.bf16.mxu0 %v4801_v1 }
  0xff   :  { %4296 = vmatpush3.bf16.msra.mxu1 %v4295_v9 }
 0x100   :  { %4297 = vmatprep.subr.bf16.mxu1 %v4801_v1 }
 0x101   :  { %4320 = vmatpush3.bf16.msra.mxu0 %v4319_v47  ;;  %v767_v47 = vld [vmem:[#allocation3 + $0x160] sm:$0xff] }
 0x102   :  { %4321 = vmatprep.subr.bf16.mxu0 %v4801_v1 }
 0x103   :  { %4299 = vmatpush3.bf16.msra.mxu1 %v4298_v12 }
 0x104   :  { %4300 = vmatprep.subr.bf16.mxu1 %v4801_v1 }
 0x105   :  { %4323 = vmatpush3.bf16.msra.mxu0 %v4322_v52  ;;  %v4376_v52 = vpack.c.bf16 %v770_v51, %v769_v50  ;;  %v1385_v51 = vld [vmem:[#allocation3 + $0x230] sm:$0xff] }
 0x106   :  { %4324 = vmatprep.subr.bf16.mxu0 %v4801_v1 }
 0x107   :  { %4302 = vmatpush3.bf16.msra.mxu1 %v4301_v15  ;;  %v3024_v15 = vld [vmem:[%s5599_s2 + $0x3] ss:$0 sm:$0xff] }
 0x108   :  { %4303 = vmatprep.subr.bf16.mxu1 %v4801_v1 }
 0x109   :  { %4326 = vmatpush3.bf16.msra.mxu0 %v4325_v58  ;;  %v933_v58 = vld [vmem:[%s5602_s5 + $0x18] sm:$0xff] }
 0x10a   :  { %4327 = vmatprep.subr.bf16.mxu0 %v4801_v1 }
 0x10b   :  { %4305 = vmatpush3.bf16.msra.mxu1 %v4304_v18 }
 0x10c   :  { %4330 = vmatprep.subr.bf16.mxu1 %v4801_v1 }
 0x10d   :  { %4329 = vmatpush3.bf16.msra.mxu0 %v4328_v2  ;;  %v937_v2 = vld [vmem:[%s5602_s5 + $0x38] sm:$0xff] }
 0x10e   :  { %3608 = vmatmul.mubr.f32.vlgmr.msra.gmra.mrb[2].mxu1 %v125_v59  ;;  %v508_v59 = vld [vmem:[#allocation3 + $0xe8] sm:$0xff]  ;;  %v4388_v3 = vpack.c.bf16 %v937_v2, %v936_v63 }
 0x10f   :  { %3677 = vmatprep.mubr.msk.f32.mxu1 %vm4800_vm0, %v4799_v0  ;;  %4332 = vmatpush3.bf16.msra.mxu1 %v4331_v26  ;;  %v4349_v60 = vpack.c.bf16 %v508_v59, %v507_v57  ;;  %v932_v57 = vld [vmem:[%s5602_s5 + $0x10] sm:$0xff] }
 0x110   :  { %4333 = vmatprep.subr.bf16.mxu1 %v4801_v1  ;;  %v4382_v59 = vpack.c.bf16 %v933_v58, %v932_v57 }
 0x113   :  { %4335 = vmatpush3.bf16.msra.mxu1 %v4334_v30  ;;  %v493_v30 = vld [vmem:[%s5601_s4 + $0x8] sm:$0xff] }
 0x114   :  { %4336 = vmatprep.subr.bf16.mxu1 %v4801_v1 }
 0x117   :  { %4338 = vmatpush3.bf16.msra.mxu1 %v4337_v36  ;;  %v760_v36 = vld [vmem:[#allocation3 + $0x128] sm:$0xff] }
 0x118   :  { %4339 = vmatprep.subr.bf16.mxu1 %v4801_v1  ;;  %v4361_v37 = vpack.c.bf16 %v760_v36, %v759_v35 }
 0x11b   :  { %4341 = vmatpush3.bf16.msra.mxu1 %v4340_v42  ;;  %v764_v42 = vld [vmem:[#allocation3 + $0x148] sm:$0xff] }
 0x11c   :  { %4342 = vmatprep.subr.bf16.mxu1 %v4801_v1  ;;  %v4367_v43 = vpack.c.bf16 %v764_v42, %v763_v41  ;;  %v1379_v42 = vld [vmem:[#allocation3 + $0x200] sm:$0xff] }
 0x11f   :  { %4344 = vmatpush3.bf16.msra.mxu1 %v4343_v48  ;;  %v768_v48 = vld [vmem:[#allocation3 + $0x168] sm:$0xff] }
 0x120   :  { %4345 = vmatprep.subr.bf16.mxu1 %v4801_v1  ;;  %v4373_v49 = vpack.c.bf16 %v768_v48, %v767_v47  ;;  %v1383_v48 = vld [vmem:[#allocation3 + $0x220] sm:$0xff] }
 0x123   :  { %4347 = vmatpush3.bf16.msra.mxu1 %v4346_v54  ;;  %v930_v54 = vld [vmem:[%s5602_s5] sm:$0xff] }
 0x124   :  { %4348 = vmatprep.subr.bf16.mxu1 %v4801_v1  ;;  %v4379_v56 = vpack.c.bf16 %v931_v55, %v930_v54  ;;  %v1387_v54 = vld [vmem:[#allocation3 + $0x240] sm:$0xff]  ;;  %v1388_v55 = vld [vmem:[#allocation3 + $0x248] sm:$0xff] }
 0x127   :  { %4350 = vmatpush3.bf16.msra.mxu1 %v4349_v60  ;;  %v934_v60 = vld [vmem:[%s5602_s5 + $0x20] sm:$0xff] }
 0x128   :  { %4351 = vmatprep.subr.bf16.mxu1 %v4801_v1  ;;  %v4385_v62 = vpack.c.bf16 %v935_v61, %v934_v60 }
 0x12b   :  { %4353 = vmatpush3.bf16.msra.mxu1 %v4352_v4 }
 0x12c   :  { %4378 = vmatprep.subr.bf16.mxu1 %v4801_v1 }
 0x1c1   :  { %v213_v7 = vpop.f32.mrb[0].mxu1  ;;  %v306_v8 = vpop.f32.mrb[2].mxu0 }
 0x1c2   :  { %v214_v9 = vadd.f32 %v3022_v5, %v213_v7  ;;  %v307_v10 = vadd.f32 %v3023_v6, %v306_v8  ;;  %v3539_v11 = vpop.f32.mrb[1].mxu1  ;;  %v3574_v12 = vpop.f32.mrb[3].mxu0  ;;  %v3034_v5 = vld [vmem:[%s5601_s4 + $0x78] sm:$0xff]  ;;  %v938_v7 = vld [vmem:[%s5602_s5 + $0x40] sm:$0xff]  ;;  %v939_v8 = vld [vmem:[%s5602_s5 + $0x48] sm:$0xff] }
 0x1c3   :  { %v941_v11 = vld [vmem:[%s5602_s5 + $0x58] sm:$0xff] }
 0x1c4   :  { %v217_v13 = vmax.f32 %v214_v9, 0.0  ;;  %v310_v14 = vmax.f32 %v307_v10, 0.0  ;;  %v4391_v9 = vpack.c.bf16 %v939_v8, %v938_v7  ;;  %v940_v10 = vld [vmem:[%s5602_s5 + $0x50] sm:$0xff]  ;;  %v1284_v8 = vld [vmem:[#allocation3 + $0x190] sm:$0xff] }
 0x1c5   :  { %v4394_v12 = vpack.c.bf16 %v941_v11, %v940_v10 }
 0x1c6   :  { %218 = vst [vmem:[#allocation2] sm:$0x3] %v217_v13  ;;  %311 = vst [vmem:[#allocation2 + $0x2] sm:$0x3] %v310_v14  ;;  %v942_v13 = vld [vmem:[%s5602_s5 + $0x60] sm:$0xff]  ;;  %v943_v14 = vld [vmem:[%s5602_s5 + $0x68] sm:$0xff] }
 0x1e1   :  { %v399_v16 = vpop.f32.mrb[2].mxu1 }
 0x1e2   :  { %v400_v17 = vadd.f32 %v3024_v15, %v399_v16  ;;  %v3609_v18 = vpop.f32.mrb[3].mxu1  ;;  %v4397_v15 = vpack.c.bf16 %v943_v14, %v942_v13  ;;  %v944_v16 = vld [vmem:[%s5602_s5 + $0x70] sm:$0xff] }
 0x1e3   :  { %v1287_v13 = vld [vmem:[#allocation3 + $0x1a8] sm:$0xff] }
 0x1e4   :  { %v403_v19 = vmax.f32 %v400_v17, 0.0  ;;  %v945_v17 = vld [vmem:[%s5602_s5 + $0x78] sm:$0xff] }
 0x1e5   :  { %v4400_v18 = vpack.c.bf16 %v945_v17, %v944_v16  ;;  %v1289_v16 = vld [vmem:[#allocation3 + $0x1b8] sm:$0xff] }
 0x1e6   :  { %404 = vst [vmem:[#allocation2 + $0x4] sm:$0x3] %v403_v19 }
 0x1ed   :  { %v405_v20 = vld [vmem:[#allocation2] sm:$0x3f] }
 0x1ee   :  { %3643 = vmatmul.mubr.f32.vlgmr.msra.gmra.mrb[4].mxu0 %v405_v20  ;;  %3678 = vmatmul.mubr.f32.vlgmr.msra.gmra.mrb[4].mxu1 %v405_v20 }
 0x1ef   :  { %3762 = vmatprep.mubr.msk.f32.mxu1 %vm4800_vm0, %v4799_v0  ;;  %3682 = vmatprep.mubr.msk.f32.mxu0 %vm584_vm3, %v3025_v21 }
 0x1f0   :  { %4380 = vmatpush3.bf16.msra.mxu1 %v4379_v56 }
 0x1f1   :  { %4381 = vmatprep.subr.bf16.mxu1 %v4801_v1 }
 0x1f4   :  { %4383 = vmatpush3.bf16.msra.mxu1 %v4382_v59 }
 0x1f5   :  { %4384 = vmatprep.subr.bf16.mxu1 %v4801_v1 }
 0x1f8   :  { %4386 = vmatpush3.bf16.msra.mxu1 %v4385_v62 }
 0x1f9   :  { %4387 = vmatprep.subr.bf16.mxu1 %v4801_v1 }
 0x1fc   :  { %4389 = vmatpush3.bf16.msra.mxu1 %v4388_v3 }
 0x1fd   :  { %4390 = vmatprep.subr.bf16.mxu1 %v4801_v1 }
 0x200   :  { %4392 = vmatpush3.bf16.msra.mxu1 %v4391_v9 }
 0x201   :  { %4393 = vmatprep.subr.bf16.mxu1 %v4801_v1 }
 0x204   :  { %4395 = vmatpush3.bf16.msra.mxu1 %v4394_v12 }
 0x205   :  { %4396 = vmatprep.subr.bf16.mxu1 %v4801_v1 }
 0x208   :  { %4398 = vmatpush3.bf16.msra.mxu1 %v4397_v15 }
 0x209   :  { %4399 = vmatprep.subr.bf16.mxu1 %v4801_v1 }
 0x20c   :  { %4401 = vmatpush3.bf16.msra.mxu1 %v4400_v18 }
 0x20d   :  { %4426 = vmatprep.subr.bf16.mxu1 %v4801_v1 }
 0x2c1   :  { %v488_v22 = vpop.f32.mrb[4].mxu0  ;;  %v577_v23 = vpop.f32.mrb[4].mxu1 }
 0x2c2   :  { %v3644_v25 = vpop.f32.mrb[5].mxu0  ;;  %v3679_v26 = vpop.f32.mrb[5].mxu1  ;;  %3680 = vmatprep.subr.msk.mxu0 %vm591_vm4, %v577_v23 }
 0x2c3   :  { %3681 = vmatpush3.msk.msra.mxu0 %vm591_vm4, %v577_v23 }
 0x2c4   :  { %3683 = vmatmul.mubr.msk.f32.vlgmr.msra.gmra.mrb[6].mxu0 %vm584_vm3, %v3026_v24  ;;  %3685 = vmatprep.subr.msk.mxu0 %vm591_vm4, %v488_v22 }
 0x2c5   :  { %3686 = vmatpush3.msk.msra.mxu0 %vm591_vm4, %v488_v22  ;;  %3687 = vmatprep.mubr.msk.f32.mxu0 %vm584_vm3, %v492_v27 }
 0x2c6   :  { %4354 = vmatprep.subr.bf16.mxu0 %v4801_v1 }
 0x2cc   :  { %3688 = vmatmul.mubr.msk.f32.vlgmr.msra.gmra.mrb[6].mxu0 %vm584_vm3, %v493_v30 }
 0x2cd   :  { %4356 = vmatpush3.bf16.msra.mxu0 %v4355_v31  ;;  %3722 = vmatprep.mubr.msk.f32.mxu0 %vm4800_vm0, %v4799_v0 }
 0x2ce   :  { %4357 = vmatprep.subr.bf16.mxu0 %v4801_v1 }
 0x2d1   :  { %4359 = vmatpush3.bf16.msra.mxu0 %v4358_v34 }
 0x2d2   :  { %4360 = vmatprep.subr.bf16.mxu0 %v4801_v1 }
 0x2d5   :  { %4362 = vmatpush3.bf16.msra.mxu0 %v4361_v37 }
 0x2d6   :  { %4363 = vmatprep.subr.bf16.mxu0 %v4801_v1 }
 0x2d9   :  { %4365 = vmatpush3.bf16.msra.mxu0 %v4364_v40  ;;  %v947_v40 = vld [vmem:[%s5603_s6 + $0x8] sm:$0xff] }
 0x2da   :  { %4366 = vmatprep.subr.bf16.mxu0 %v4801_v1  ;;  %v4427_v41 = vpack.c.bf16 %v947_v40, %v946_v39  ;;  %v1297_v39 = vld [vmem:[#allocation3 + $0x1f8] sm:$0xff] }
 0x2dd   :  { %4368 = vmatpush3.bf16.msra.mxu0 %v4367_v43  ;;  %v1380_v43 = vld [vmem:[#allocation3 + $0x208] sm:$0xff] }
 0x2de   :  { %4369 = vmatprep.subr.bf16.mxu0 %v4801_v1  ;;  %v4464_v44 = vpack.c.bf16 %v1380_v43, %v1379_v42  ;;  %v1678_v42 = vld [vmem:[#allocation3 + $0x288] sm:$0xff] }
 0x2e1   :  { %4371 = vmatpush3.bf16.msra.mxu0 %v4370_v46  ;;  %v1382_v46 = vld [vmem:[#allocation3 + $0x218] sm:$0xff] }
 0x2e2   :  { %4372 = vmatprep.subr.bf16.mxu0 %v4801_v1  ;;  %v4468_v47 = vpack.c.bf16 %v1382_v46, %v1381_v45 }
 0x2e5   :  { %4374 = vmatpush3.bf16.msra.mxu0 %v4373_v49  ;;  %v1384_v49 = vld [vmem:[#allocation3 + $0x228] sm:$0xff] }
 0x2e6   :  { %4375 = vmatprep.subr.bf16.mxu0 %v4801_v1  ;;  %v4472_v50 = vpack.c.bf16 %v1384_v49, %v1383_v48 }
 0x2e9   :  { %4377 = vmatpush3.bf16.msra.mxu0 %v4376_v52  ;;  %v1386_v52 = vld [vmem:[#allocation3 + $0x238] sm:$0xff] }
 0x2ec   :  { %3723 = vmatmul.mubr.f32.vlgmr.msra.gmra.mrb[8].mxu0 %v405_v20 }
 0x2ed   :  { %3727 = vmatprep.mubr.msk.f32.mxu0 %vm584_vm3, %v3033_v53  ;;  %v4476_v53 = vpack.c.bf16 %v1386_v52, %v1385_v51 }
 0x3bf   :  { %v837_v4 = vpop.f32.mrb[8].mxu0 }
 0x3c0   :  { %v3724_v6 = vpop.f32.mrb[9].mxu0  ;;  %3725 = vmatprep.subr.msk.mxu0 %vm591_vm4, %v837_v4 }
 0x3c1   :  { %3726 = vmatpush3.msk.msra.mxu0 %vm591_vm4, %v837_v4  ;;  %v1282_v4 = vld [vmem:[#allocation3 + $0x180] sm:$0xff] }
 0x3c2   :  { %3728 = vmatmul.mubr.msk.f32.vlgmr.msra.gmra.mrb[6].mxu0 %vm584_vm3, %v3034_v5  ;;  %4402 = vmatprep.subr.bf16.mxu0 %v4801_v1  ;;  %v1283_v5 = vld [vmem:[#allocation3 + $0x188] sm:$0xff] }
 0x3c3   :  { %4404 = vmatpush3.bf16.msra.mxu0 %v4379_v56  ;;  %3797 = vmatprep.mubr.msk.f32.mxu0 %vm4800_vm0, %v4799_v0  ;;  %v4480_v56 = vpack.c.bf16 %v1388_v55, %v1387_v54  ;;  %v4432_v6 = vpack.c.bf16 %v1283_v5, %v1282_v4  ;;  %v3040_v55 = vld [vmem:[%s5599_s2 + $0x4] ss:$0 sm:$0xff]  ;;  %v1683_v4 = vld [vmem:[#allocation3 + $0x2b0] sm:$0xff] }
 0x3c4   :  { %4405 = vmatprep.subr.bf16.mxu0 %v4801_v1  ;;  %v1684_v5 = vld [vmem:[#allocation3 + $0x2b8] sm:$0xff] }
 0x3c7   :  { %4407 = vmatpush3.bf16.msra.mxu0 %v4382_v59 }
 0x3c8   :  { %4408 = vmatprep.subr.bf16.mxu0 %v4801_v1 }
 0x3cb   :  { %4410 = vmatpush3.bf16.msra.mxu0 %v4385_v62 }
 0x3cc   :  { %4411 = vmatprep.subr.bf16.mxu0 %v4801_v1 }
 0x3cf   :  { %4413 = vmatpush3.bf16.msra.mxu0 %v4388_v3 }
 0x3d0   :  { %4414 = vmatprep.subr.bf16.mxu0 %v4801_v1 }
 0x3d3   :  { %4416 = vmatpush3.bf16.msra.mxu0 %v4391_v9  ;;  %v1285_v9 = vld [vmem:[#allocation3 + $0x198] sm:$0xff] }
 0x3d4   :  { %4417 = vmatprep.subr.bf16.mxu0 %v4801_v1  ;;  %v4436_v11 = vpack.c.bf16 %v1285_v9, %v1284_v8  ;;  %v1686_v8 = vld [vmem:[#allocation3 + $0x2c8] sm:$0xff] }
 0x3d7   :  { %4419 = vmatpush3.bf16.msra.mxu0 %v4394_v12  ;;  %v1286_v12 = vld [vmem:[#allocation3 + $0x1a0] sm:$0xff] }
 0x3d8   :  { %4420 = vmatprep.subr.bf16.mxu0 %v4801_v1  ;;  %v4440_v14 = vpack.c.bf16 %v1287_v13, %v1286_v12  ;;  %v1689_v13 = vld [vmem:[#allocation3 + $0x2e0] sm:$0xff] }
 0x3db   :  { %4422 = vmatpush3.bf16.msra.mxu0 %v4397_v15  ;;  %v1288_v15 = vld [vmem:[#allocation3 + $0x1b0] sm:$0xff] }
 0x3dc   :  { %4423 = vmatprep.subr.bf16.mxu0 %v4801_v1  ;;  %v4444_v17 = vpack.c.bf16 %v1289_v16, %v1288_v15  ;;  %v1691_v16 = vld [vmem:[#allocation3 + $0x2f0] sm:$0xff] }
 0x3df   :  { %4425 = vmatpush3.bf16.msra.mxu0 %v4400_v18  ;;  %v1290_v18 = vld [vmem:[#allocation3 + $0x1c0] sm:$0xff] }
 0x3e0   :  { %4465 = vmatprep.subr.bf16.mxu0 %v4464_v44 }
 0x495   :  { %v5180_v19 = vpop.f32.mrb[6].mxu0 }
 0x496   :  { %v948_v20 = vsel %vm591_vm4, %v5180_v19, 0.0  ;;  %v957_v21 = vmul.f32 %v5180_v19, %v5180_v19  ;;  %v5186_v22 = vpop.f32.mrb[7].mxu0 }
 0x497   :  { %v949_v23 = vadd.f32 %v948_v20, %v5186_v22  ;;  %v956_v24 = vmul.f32 %v5186_v22, %v5186_v22  ;;  %v1291_v20 = vld [vmem:[#allocation3 + $0x1c8] sm:$0xff] }
 0x498   :  { %v958_v25 = vsel %vm591_vm4, %v957_v21, 0.0  ;;  %v4448_v21 = vpack.c.bf16 %v1291_v20, %v1290_v18  ;;  %v3045_v20 = vld [vmem:[%s5601_s4 + $0xe0] sm:$0xff] }
 0x499   :  { %v950_v26 = vrot.slane %v949_v23, 4  ;;  %v959_v27 = vadd.f32 %v958_v25, %v956_v24  ;;  %v1390_v24 = vld [vmem:[#allocation3 + $0x258] sm:$0xff] }
 0x49b   :  { %v951_v28 = vadd.f32 %v950_v26, %v949_v23  ;;  %v960_v29 = vrot.slane %v959_v27, 4  ;;  %v1389_v23 = vld [vmem:[#allocation3 + $0x250] sm:$0xff] }
 0x49c   :  { %v4484_v25 = vpack.c.bf16 %v1390_v24, %v1389_v23  ;;  %v1292_v26 = vld [vmem:[#allocation3 + $0x1d0] sm:$0xff]  ;;  %v3069_v23 = vld [vmem:[%s5602_s5 + $0x88] sm:$0xff] }
 0x49d   :  { %v952_v30 = vrot.slane %v951_v28, 2  ;;  %v961_v31 = vadd.f32 %v960_v29, %v959_v27  ;;  %v1293_v27 = vld [vmem:[#allocation3 + $0x1d8] sm:$0xff]  ;;  %v1391_v29 = vld [vmem:[#allocation3 + $0x260] sm:$0xff] }
 0x49f   :  { %v953_v32 = vadd.f32 %v952_v30, %v951_v28  ;;  %v962_v33 = vrot.slane %v961_v31, 2  ;;  %v4452_v28 = vpack.c.bf16 %v1293_v27, %v1292_v26  ;;  %v1392_v30 = vld [vmem:[#allocation3 + $0x268] sm:$0xff]  ;;  %v3071_v26 = vld [vmem:[%s5602_s5 + $0x98] sm:$0xff] }
 0x4a1   :  { %v954_v34 = vrot.slane %v953_v32, 1  ;;  %v963_v35 = vadd.f32 %v962_v33, %v961_v31  ;;  %v4488_v31 = vpack.c.bf16 %v1392_v30, %v1391_v29  ;;  %v1295_v33 = vld [vmem:[#allocation3 + $0x1e8] sm:$0xff]  ;;  %v3073_v29 = vld [vmem:[%s5602_s5 + $0xa8] sm:$0xff] }
 0x4a3   :  { %v955_v36 = vadd.f32 %v954_v34, %v953_v32  ;;  %v964_v37 = vrot.slane %v963_v35, 1  ;;  %v1294_v32 = vld [vmem:[#allocation3 + $0x1e0] sm:$0xff] }
 0x4a4   :  { %v4456_v34 = vpack.c.bf16 %v1295_v33, %v1294_v32 }
 0x4a5   :  { %3763 = vmatmul.mubr.f32.vlgmr.msra.gmra.mrb[6].mxu1 %v955_v36  ;;  %v965_v38 = vadd.f32 %v964_v37, %v963_v35  ;;  %v1393_v35 = vld [vmem:[#allocation3 + $0x270] sm:$0xff]  ;;  %v1394_v36 = vld [vmem:[#allocation3 + $0x278] sm:$0xff] }
 0x4a6   :  { %3804 = vmatprep.mubr.msk.f32.mxu1 %vm4800_vm0, %v4799_v0  ;;  %4428 = vmatpush3.bf16.msra.mxu1 %v4427_v41  ;;  %v4492_v37 = vpack.c.bf16 %v1394_v36, %v1393_v35  ;;  %v3085_v35 = vld [vmem:[%s5603_s6 + $0x18] sm:$0xff] }
 0x4a7   :  { %3798 = vmatmul.mubr.f32.vlgmr.msra.gmra.mrb[10].mxu0 %v965_v38  ;;  %4429 = vmatprep.subr.bf16.mxu1 %v4801_v1  ;;  %v1296_v38 = vld [vmem:[#allocation3 + $0x1f0] sm:$0xff] }
 0x4a8   :  { %4467 = vmatpush3.bf16.msra.mxu0 %v4464_v44  ;;  %v4460_v40 = vpack.c.bf16 %v1297_v39, %v1296_v38  ;;  %v1261_v44 = vlaneseq  ;;  %v3046_v38 = vld [vmem:[%s5601_s4 + $0xe8] sm:$0xff]  ;;  %v3047_v39 = vld [vmem:[%s5601_s4 + $0xf0] sm:$0xff] }
 0x4a9   :  { %4469 = vmatprep.subr.bf16.mxu0 %v4468_v47 }
 0x4aa   :  { %v1262_v45 = vshrl.u32 %v1261_v44, 7  ;;  %v3044_v44 = vld [vmem:[%s5601_s4 + $0xc0] sm:$0xff] }
 0x4ac   :  { %4471 = vmatpush3.bf16.msra.mxu0 %v4468_v47  ;;  %v5205_v46 = vsub.s32 0, %v1262_v45  ;;  %v3059_v45 = vld [vmem:[%s5601_s4 + $0x118] sm:$0xff] }
 0x4ad   :  { %4473 = vmatprep.subr.bf16.mxu0 %v4472_v50 }
 0x4b0   :  { %4475 = vmatpush3.bf16.msra.mxu0 %v4472_v50 }
 0x4b1   :  { %4477 = vmatprep.subr.bf16.mxu0 %v4476_v53 }
 0x4b4   :  { %4479 = vmatpush3.bf16.msra.mxu0 %v4476_v53 }
 0x4b5   :  { %4481 = vmatprep.subr.bf16.mxu0 %v4480_v56 }
 0x4b8   :  { %4483 = vmatpush3.bf16.msra.mxu0 %v4480_v56 }
 0x4b9   :  { %4485 = vmatprep.subr.bf16.mxu0 %v4484_v25 }
 0x4bc   :  { %4487 = vmatpush3.bf16.msra.mxu0 %v4484_v25  ;;  %v3070_v25 = vld [vmem:[%s5602_s5 + $0x90] sm:$0xff] }
 0x4bd   :  { %4489 = vmatprep.subr.bf16.mxu0 %v4488_v31  ;;  %v4550_v27 = vpack.c.bf16 %v3071_v26, %v3070_v25 }
 0x4c0   :  { %4491 = vmatpush3.bf16.msra.mxu0 %v4488_v31 }
 0x4c1   :  { %4493 = vmatprep.subr.bf16.mxu0 %v4492_v37 }
 0x4c4   :  { %4495 = vmatpush3.bf16.msra.mxu0 %v4492_v37 }
 0x578   :  { %v1032_v57 = vpop.f32.mrb[6].mxu1 }
 0x579   :  { %v1036_v58 = vmul.f32 0.010204081, %v1032_v57  ;;  %v3764_v59 = vpop.f32.mrb[7].mxu1 }
 0x57a   :  { %v1103_v60 = vpop.f32.mrb[10].mxu0 }
 0x57b   :  { %v1108_v61 = vmul.f32 %v1036_v58, %v1036_v58  ;;  %v1107_v62 = vmul.f32 0.010204081, %v1103_v60  ;;  %v3799_v63 = vpop.f32.mrb[11].mxu0  ;;  %v1679_v60 = vld [vmem:[#allocation3 + $0x290] sm:$0xff] }
 0x57d   :  { %v1109_v2 = vsub.f32 %v1107_v62, %v1108_v61  ;;  %v1680_v61 = vld [vmem:[#allocation3 + $0x298] sm:$0xff] }
 0x57f   :  { %v1110_v3 = vadd.f32 1e-05, %v1109_v2  ;;  %v4512_v2 = vpack.c.bf16 %v1680_v61, %v1679_v60  ;;  %v3079_v60 = vld [vmem:[%s5602_s5 + $0xd8] sm:$0xff] }
 0x581   :  { %4740 = vrsqrt.f32 %v1110_v3 }
 0x58b   :  { %v4741_v7 = vpop.eup %4740 }
 0x58c   :  { %3805 = vmatmul.mubr.msk.f32.vlgmr.msra.gmra.mrb[8].mxu1 %vm1112_vm5, %v4741_v7  ;;  %v1186_v10 = vmul.f32 %v4741_v7, %v1036_v58  ;;  %v1685_v7 = vld [vmem:[#allocation3 + $0x2c0] sm:$0xff] }
 0x58d   :  { %4431 = vmatpush3.bf16.msra.mxu1 %v4427_v41  ;;  %3811 = vmatprep.mubr.msk.f32.mxu1 %vm4800_vm0, %v4799_v0  ;;  %v1677_v41 = vld [vmem:[#allocation3 + $0x280] sm:$0xff]  ;;  %v4524_v9 = vpack.c.bf16 %v1686_v8, %v1685_v7 }
 0x58e   :  { %4433 = vmatprep.subr.bf16.mxu1 %v4432_v6  ;;  %v4508_v43 = vpack.c.bf16 %v1678_v42, %v1677_v41  ;;  %v3041_v41 = vld [vmem:[%s5601_s4 + $0xa8] sm:$0xff]  ;;  %v3042_v42 = vld [vmem:[%s5601_s4 + $0xb0] sm:$0xff] }
 0x590   :  { %3812 = vmatmul.mubr.msk.f32.vlgmr.msra.gmra.mrb[10].mxu1 %vm1112_vm5, %v1186_v10  ;;  %4509 = vmatprep.subr.bf16.mxu0 %v4508_v43  ;;  %v1687_v10 = vld [vmem:[#allocation3 + $0x2d0] sm:$0xff] }
 0x591   :  { %4435 = vmatpush3.bf16.msra.mxu1 %v4432_v6  ;;  %v4520_v6 = vpack.c.bf16 %v1684_v5, %v1683_v4 }
 0x592   :  { %4437 = vmatprep.subr.bf16.mxu1 %v4436_v11 }
 0x595   :  { %4439 = vmatpush3.bf16.msra.mxu1 %v4436_v11  ;;  %v1688_v11 = vld [vmem:[#allocation3 + $0x2d8] sm:$0xff] }
 0x596   :  { %4441 = vmatprep.subr.bf16.mxu1 %v4440_v14  ;;  %v4528_v12 = vpack.c.bf16 %v1688_v11, %v1687_v10 }
 0x599   :  { %4443 = vmatpush3.bf16.msra.mxu1 %v4440_v14  ;;  %v1690_v14 = vld [vmem:[#allocation3 + $0x2e8] sm:$0xff] }
 0x59a   :  { %4445 = vmatprep.subr.bf16.mxu1 %v4444_v17  ;;  %v4532_v15 = vpack.c.bf16 %v1690_v14, %v1689_v13 }
 0x59d   :  { %4447 = vmatpush3.bf16.msra.mxu1 %v4444_v17  ;;  %v1692_v17 = vld [vmem:[#allocation3 + $0x2f8] sm:$0xff] }
 0x59e   :  { %4449 = vmatprep.subr.bf16.mxu1 %v4448_v21  ;;  %v4536_v18 = vpack.c.bf16 %v1692_v17, %v1691_v16 }
 0x5a1   :  { %4451 = vmatpush3.bf16.msra.mxu1 %v4448_v21  ;;  %v3068_v21 = vld [vmem:[%s5602_s5 + $0x80] sm:$0xff] }
 0x5a2   :  { %4453 = vmatprep.subr.bf16.mxu1 %v4452_v28  ;;  %v4547_v24 = vpack.c.bf16 %v3069_v23, %v3068_v21 }
 0x5a5   :  { %4455 = vmatpush3.bf16.msra.mxu1 %v4452_v28  ;;  %v3072_v28 = vld [vmem:[%s5602_s5 + $0xa0] sm:$0xff] }
 0x5a6   :  { %4457 = vmatprep.subr.bf16.mxu1 %v4456_v34  ;;  %v4553_v30 = vpack.c.bf16 %v3073_v29, %v3072_v28 }
 0x5a9   :  { %4459 = vmatpush3.bf16.msra.mxu1 %v4456_v34 }
 0x5aa   :  { %4461 = vmatprep.subr.bf16.mxu1 %v4460_v40 }
 0x5ad   :  { %4463 = vmatpush3.bf16.msra.mxu1 %v4460_v40  ;;  %v3048_v40 = vld [vmem:[%s5601_s4 + $0xf8] sm:$0xff] }
 0x65f   :  { %v1182_v47 = vpop.f32.mrb[8].mxu1 }
 0x660   :  { %v1264_v48 = vrot.slane %v1182_v47, %v5205_v46  ;;  %v3806_v49 = vpop.f32.mrb[9].mxu1 }
 0x662   :  { %v1265_v50 = vmul.f32 %v1264_v48, %v5186_v22  ;;  %v1266_v51 = vmul.f32 %v5180_v19, %v1264_v48  ;;  %v1681_v19 = vld [vmem:[#allocation3 + $0x2a0] sm:$0xff]  ;;  %v1682_v22 = vld [vmem:[#allocation3 + $0x2a8] sm:$0xff] }
 0x663   :  { %v1256_v52 = vpop.f32.mrb[10].mxu1  ;;  %v4516_v3 = vpack.c.bf16 %v1682_v22, %v1681_v19  ;;  %v3082_v19 = vld [vmem:[%s5602_s5 + $0xf0] sm:$0xff]  ;;  %v3083_v22 = vld [vmem:[%s5602_s5 + $0xf8] sm:$0xff] }
 0x664   :  { %v1270_v53 = vrot.slane %v1256_v52, %v5205_v46  ;;  %v3813_v54 = vpop.f32.mrb[11].mxu1  ;;  %v3062_v52 = vld [vmem:[%s5601_s4 + $0x130] sm:$0xff] }
 0x665   :  { %v3075_v54 = vld [vmem:[%s5602_s5 + $0xb8] sm:$0xff] }
 0x666   :  { %v1271_v56 = vsub.f32 %v1265_v50, %v1270_v53  ;;  %v1272_v57 = vsub.f32 %v1266_v51, %v1270_v53  ;;  %v3060_v50 = vld [vmem:[%s5601_s4 + $0x120] sm:$0xff]  ;;  %v3061_v51 = vld [vmem:[%s5601_s4 + $0x128] sm:$0xff]  ;;  %v3074_v53 = vld [vmem:[%s5602_s5 + $0xb0] sm:$0xff] }
 0x668   :  { %v1278_v58 = vadd.f32 %v3040_v55, %v1272_v57  ;;  %v1277_v59 = vadd.f32 %v3040_v55, %v1271_v56  ;;  %v4556_v55 = vpack.c.bf16 %v3075_v54, %v3074_v53  ;;  %v3076_v56 = vld [vmem:[%s5602_s5 + $0xc0] sm:$0xff]  ;;  %v3077_v57 = vld [vmem:[%s5602_s5 + $0xc8] sm:$0xff] }
 0x66a   :  { %v1280_v62 = vmax.f32 %v1278_v58, 0.0  ;;  %v1279_v63 = vmax.f32 %v1277_v59, 0.0  ;;  %v4559_v58 = vpack.c.bf16 %v3077_v57, %v3076_v56  ;;  %v3078_v59 = vld [vmem:[%s5602_s5 + $0xd0] sm:$0xff] }
 0x66b   :  { %v4562_v61 = vpack.c.bf16 %v3079_v60, %v3078_v59 }
 0x66c   :  { %3846 = vmatprep.mubr.f32.mxu1 %v1279_v63  ;;  %3881 = vmatprep.mubr.f32.mxu0 %v1279_v63 }
 0x66d   :  { %3847 = vmatmul.mubr.f32.vlgmr.msra.gmra.mrb[12].mxu1 %v1280_v62  ;;  %3882 = vmatmul.mubr.f32.vlgmr.msra.gmra.mrb[12].mxu0 %v1280_v62 }
 0x66e   :  { %4511 = vmatpush3.bf16.msra.mxu0 %v4508_v43  ;;  %3936 = vmatprep.mubr.f32.mxu0 %v1279_v63  ;;  %v3043_v43 = vld [vmem:[%s5601_s4 + $0xb8] sm:$0xff]  ;;  %v3081_v63 = vld [vmem:[%s5602_s5 + $0xe8] sm:$0xff] }
 0x66f   :  { %4513 = vmatprep.subr.bf16.mxu0 %v4512_v2  ;;  %3888 = vmatprep.mubr.msk.f32.mxu1 %vm1475_vm6, %v3045_v20 }
 0x672   :  { %4515 = vmatpush3.bf16.msra.mxu0 %v4512_v2 }
 0x673   :  { %4517 = vmatprep.subr.bf16.mxu0 %v4516_v3 }
 0x676   :  { %4519 = vmatpush3.bf16.msra.mxu0 %v4516_v3  ;;  %v4568_v3 = vpack.c.bf16 %v3083_v22, %v3082_v19  ;;  %v2246_v22 = vld [vmem:[#allocation3 + $0x310] sm:$0xff] }
 0x677   :  { %4521 = vmatprep.subr.bf16.mxu0 %v4520_v6 }
 0x67a   :  { %4523 = vmatpush3.bf16.msra.mxu0 %v4520_v6 }
 0x67b   :  { %4525 = vmatprep.subr.bf16.mxu0 %v4524_v9 }
 0x67e   :  { %4527 = vmatpush3.bf16.msra.mxu0 %v4524_v9 }
 0x67f   :  { %4529 = vmatprep.subr.bf16.mxu0 %v4528_v12 }
 0x682   :  { %4531 = vmatpush3.bf16.msra.mxu0 %v4528_v12 }
 0x683   :  { %4533 = vmatprep.subr.bf16.mxu0 %v4532_v15 }
 0x686   :  { %4535 = vmatpush3.bf16.msra.mxu0 %v4532_v15 }
 0x687   :  { %4537 = vmatprep.subr.bf16.mxu0 %v4536_v18 }
 0x68a   :  { %4539 = vmatpush3.bf16.msra.mxu0 %v4536_v18 }
 0x68b   :  { %4570 = vmatprep.subr.bf16.mxu0 %v4801_v1 }
 0x68d   :  { %3937 = vmatmul.mubr.f32.vlgmr.msra.gmra.mrb[14].mxu0 %v1280_v62  ;;  %v3080_v62 = vld [vmem:[%s5602_s5 + $0xe0] sm:$0xff] }
 0x68e   :  { %4016 = vmatprep.mubr.msk.f32.mxu0 %vm4800_vm0, %v4799_v0  ;;  %4572 = vmatpush3.bf16.msra.mxu0 %v4547_v24  ;;  %v4565_v2 = vpack.c.bf16 %v3081_v63, %v3080_v62  ;;  %v2244_v62 = vld [vmem:[#allocation3 + $0x300] sm:$0xff]  ;;  %v2245_v63 = vld [vmem:[#allocation3 + $0x308] sm:$0xff] }
 0x68f   :  { %4573 = vmatprep.subr.bf16.mxu0 %v4801_v1 }
 0x692   :  { %4575 = vmatpush3.bf16.msra.mxu0 %v4550_v27 }
 0x693   :  { %4576 = vmatprep.subr.bf16.mxu0 %v4801_v1 }
 0x696   :  { %4578 = vmatpush3.bf16.msra.mxu0 %v4553_v30 }
 0x697   :  { %4579 = vmatprep.subr.bf16.mxu0 %v4801_v1 }
 0x69a   :  { %4581 = vmatpush3.bf16.msra.mxu0 %v4556_v55 }
 0x69b   :  { %4582 = vmatprep.subr.bf16.mxu0 %v4801_v1 }
 0x69e   :  { %4584 = vmatpush3.bf16.msra.mxu0 %v4559_v58 }
 0x69f   :  { %4585 = vmatprep.subr.bf16.mxu0 %v4801_v1 }
 0x6a2   :  { %4587 = vmatpush3.bf16.msra.mxu0 %v4562_v61 }
 0x6a3   :  { %4588 = vmatprep.subr.bf16.mxu0 %v4801_v1 }
 0x6a6   :  { %4590 = vmatpush3.bf16.msra.mxu0 %v4565_v2 }
 0x6a7   :  { %4591 = vmatprep.subr.bf16.mxu0 %v4801_v1 }
 0x6aa   :  { %4593 = vmatpush3.bf16.msra.mxu0 %v4568_v3 }
 0x740   :  { %v3848_v31 = vpop.f32.mrb[12].mxu1  ;;  %v3883_v32 = vpop.f32.mrb[12].mxu0 }
 0x741   :  { %v1364_v33 = vpop.f32.mrb[13].mxu1  ;;  %v1461_v34 = vpop.f32.mrb[13].mxu0 }
 0x742   :  { %v4502_v36 = vpack.c.bf16 %v3848_v31, %v1364_v33  ;;  %v4496_v37 = vpack.c.bf16 %v3883_v32, %v1461_v34  ;;  %v3084_v34 = vld [vmem:[%s5603_s6 + $0x10] sm:$0xff] }
 0x744   :  { %4498 = vmatprep.subr.msk.bf16.mxu1 %vm5244_vm8, %v4496_v37 }
 0x745   :  { %4501 = vmatpush3.bf16.msk.msra.mxu1 %vm5244_vm8, %v4496_v37  ;;  %v2354_v37 = vld [vmem:[#allocation3 + $0x380] sm:$0xff] }
 0x746   :  { %4504 = vmatprep.subr.msk.bf16.mxu1 %vm5244_vm8, %v4502_v36 }
 0x748   :  { %3889 = vmatmul.mubr.msk.f32.vlgmr.msra.gmra.mrb[14].mxu1 %vm1475_vm6, %v3046_v38  ;;  %v2355_v38 = vld [vmem:[#allocation3 + $0x388] sm:$0xff] }
 0x749   :  { %4507 = vmatpush3.bf16.msk.msra.mxu1 %vm5244_vm8, %v4502_v36  ;;  %3891 = vmatprep.mubr.msk.f32.mxu1 %vm1475_vm6, %v3047_v39  ;;  %v4595_v36 = vpack.c.bf16 %v3085_v35, %v3084_v34  ;;  %v4632_v39 = vpack.c.bf16 %v2355_v38, %v2354_v37  ;;  %v2259_v34 = vld [vmem:[#allocation3 + $0x378] sm:$0xff]  ;;  %v2368_v35 = vld [vmem:[#allocation3 + $0x3f0] sm:$0xff] }
 0x74a   :  { %v2369_v37 = vld [vmem:[#allocation3 + $0x3f8] sm:$0xff] }
 0x74b   :  { %4633 = vmatprep.subr.bf16.mxu0 %v4632_v39  ;;  %v4660_v38 = vpack.c.bf16 %v2369_v37, %v2368_v35  ;;  %v2724_v37 = vld [vmem:[#allocation3 + $0x458] sm:$0xff] }
 0x74c   :  { %3892 = vmatmul.mubr.msk.f32.gmra.mrb[16].mxu1 %vm1475_vm6, %v3048_v40  ;;  %v2356_v40 = vld [vmem:[#allocation3 + $0x390] sm:$0xff] }
 0x74d   :  { %3898 = vmatprep.mubr.msk.f32.mxu1 %vm1475_vm6, %v3041_v41  ;;  %v2357_v41 = vld [vmem:[#allocation3 + $0x398] sm:$0xff] }
 0x750   :  { %3899 = vmatmul.mubr.msk.f32.vlgmr.msra.gmra.mrb[14].mxu1 %vm1475_vm6, %v3042_v42  ;;  %v4636_v42 = vpack.c.bf16 %v2357_v41, %v2356_v40 }
 0x751   :  { %3901 = vmatprep.mubr.msk.f32.mxu1 %vm1475_vm6, %v3043_v43  ;;  %v2358_v43 = vld [vmem:[#allocation3 + $0x3a0] sm:$0xff] }
 0x754   :  { %3902 = vmatmul.mubr.msk.f32.gmra.mrb[16].mxu1 %vm1475_vm6, %v3044_v44  ;;  %v2359_v44 = vld [vmem:[#allocation3 + $0x3a8] sm:$0xff] }
 0x755   :  { %3943 = vmatprep.mubr.msk.f32.mxu1 %vm1475_vm6, %v3059_v45  ;;  %v4640_v45 = vpack.c.bf16 %v2359_v44, %v2358_v43 }
 0x760   :  { %v3938_v47 = vpop.f32.mrb[14].mxu0 }
 0x761   :  { %v1759_v48 = vpop.f32.mrb[15].mxu0 }
 0x762   :  { %v4540_v49 = vpack.c.bf16 %v3938_v47, %v1759_v48  ;;  %v2360_v47 = vld [vmem:[#allocation3 + $0x3b0] sm:$0xff]  ;;  %v2361_v48 = vld [vmem:[#allocation3 + $0x3b8] sm:$0xff] }
 0x764   :  { %4542 = vmatprep.subr.msk.bf16.mxu1 %vm5244_vm8, %v4540_v49 }
 0x765   :  { %4545 = vmatpush3.bf16.msk.msra.mxu1 %vm5244_vm8, %v4540_v49  ;;  %v4644_v49 = vpack.c.bf16 %v2361_v48, %v2360_v47 }
 0x766   :  { %4546 = vmatprep.subr.bf16.mxu1 %v4801_v1 }
 0x768   :  { %3944 = vmatmul.mubr.msk.f32.vlgmr.msra.gmra.mrb[14].mxu1 %vm1475_vm6, %v3060_v50  ;;  %v2362_v50 = vld [vmem:[#allocation3 + $0x3c0] sm:$0xff] }
 0x769   :  { %3946 = vmatprep.mubr.msk.f32.mxu1 %vm1475_vm6, %v3061_v51  ;;  %4548 = vmatpush3.bf16.msra.mxu1 %v4547_v24  ;;  %v2363_v51 = vld [vmem:[#allocation3 + $0x3c8] sm:$0xff] }
 0x76a   :  { %4549 = vmatprep.subr.bf16.mxu1 %v4801_v1 }
 0x76c   :  { %3947 = vmatmul.mubr.msk.f32.gmra.mrb[16].mxu1 %vm1475_vm6, %v3062_v52  ;;  %v4648_v52 = vpack.c.bf16 %v2363_v51, %v2362_v50  ;;  %v3088_v50 = vld [vmem:[%s5599_s2 + $0x5] ss:$0 sm:$0xff] }
 0x76d   :  { %4551 = vmatpush3.bf16.msra.mxu1 %v4550_v27  ;;  %3981 = vmatprep.mubr.msk.f32.mxu1 %vm4800_vm0, %v4799_v0 }
 0x76e   :  { %4552 = vmatprep.subr.bf16.mxu1 %v4801_v1 }
 0x771   :  { %4554 = vmatpush3.bf16.msra.mxu1 %v4553_v30 }
 0x772   :  { %4555 = vmatprep.subr.bf16.mxu1 %v4801_v1 }
 0x775   :  { %4557 = vmatpush3.bf16.msra.mxu1 %v4556_v55 }
 0x776   :  { %4558 = vmatprep.subr.bf16.mxu1 %v4801_v1 }
 0x779   :  { %4560 = vmatpush3.bf16.msra.mxu1 %v4559_v58 }
 0x77a   :  { %4561 = vmatprep.subr.bf16.mxu1 %v4801_v1 }
 0x77d   :  { %4563 = vmatpush3.bf16.msra.mxu1 %v4562_v61 }
 0x77e   :  { %4564 = vmatprep.subr.bf16.mxu1 %v4801_v1 }
 0x781   :  { %4566 = vmatpush3.bf16.msra.mxu1 %v4565_v2  ;;  %v4600_v2 = vpack.c.bf16 %v2245_v63, %v2244_v62 }
 0x782   :  { %4567 = vmatprep.subr.bf16.mxu1 %v4801_v1 }
 0x785   :  { %4569 = vmatpush3.bf16.msra.mxu1 %v4568_v3  ;;  %v2247_v3 = vld [vmem:[#allocation3 + $0x318] sm:$0xff] }
 0x786   :  { %4594 = vmatprep.subr.bf16.mxu1 %v4801_v1 }
 0x83b   :  { %v5349_v4 = vpop.f32.mrb[14].mxu1 }
 0x83c   :  { %v1908_v5 = vmul.f32 %v5349_v4, %v5349_v4  ;;  %v5353_v6 = vpop.f32.mrb[15].mxu1 }
 0x83d   :  { %v1897_v7 = vadd.f32 %v5349_v4, %v5353_v6  ;;  %v1907_v8 = vmul.f32 %v5353_v6, %v5353_v6 }
 0x83f   :  { %v1911_v9 = vadd.f32 %v1908_v5, %v1907_v8  ;;  %v5359_v10 = vpop.f32.mrb[16].mxu1  ;;  %v2248_v8 = vld [vmem:[#allocation3 + $0x320] sm:$0xff] }
 0x840   :  { %v1910_v11 = vmul.f32 %v5359_v10, %v5359_v10  ;;  %v5363_v12 = vpop.f32.mrb[17].mxu1  ;;  %v1899_v15 = vsel %vm51_vm1, %v5359_v10, 0.0 }
 0x841   :  { %v1898_v13 = vadd.f32 %v1897_v7, %v5363_v12  ;;  %v1909_v14 = vmul.f32 %v5363_v12, %v5363_v12  ;;  %v4604_v7 = vpack.c.bf16 %v2247_v3, %v2246_v22 }
 0x842   :  { %v1913_v18 = vsel %vm51_vm1, %v1910_v11, 0.0 }
 0x843   :  { %v1900_v16 = vadd.f32 %v1899_v15, %v1898_v13  ;;  %v1912_v17 = vadd.f32 %v1911_v9, %v1909_v14  ;;  %v2249_v9 = vld [vmem:[#allocation3 + $0x328] sm:$0xff]  ;;  %v2250_v13 = vld [vmem:[#allocation3 + $0x330] sm:$0xff]  ;;  %v2251_v14 = vld [vmem:[#allocation3 + $0x338] sm:$0xff] }
 0x844   :  { %v4608_v11 = vpack.c.bf16 %v2249_v9, %v2248_v8  ;;  %v4612_v15 = vpack.c.bf16 %v2251_v14, %v2250_v13  ;;  %v2715_v14 = vld [vmem:[#allocation3 + $0x410] sm:$0xff]  ;;  %v3124_v8 = vld [vmem:[%s5601_s4 + $0x1e8] sm:$0xff] }
 0x845   :  { %v1901_v20 = vrot.slane %v1900_v16, 4  ;;  %v1914_v21 = vadd.f32 %v1913_v18, %v1912_v17  ;;  %v2253_v17 = vld [vmem:[#allocation3 + $0x348] sm:$0xff] }
 0x847   :  { %v1902_v23 = vadd.f32 %v1901_v20, %v1900_v16  ;;  %v1915_v24 = vrot.slane %v1914_v21, 4  ;;  %v2252_v16 = vld [vmem:[#allocation3 + $0x340] sm:$0xff]  ;;  %v2254_v20 = vld [vmem:[#allocation3 + $0x350] sm:$0xff] }
 0x848   :  { %v4616_v18 = vpack.c.bf16 %v2253_v17, %v2252_v16  ;;  %v3096_v16 = vld [vmem:[%s5601_s4 + $0x188] sm:$0xff]  ;;  %v3089_v17 = vld [vmem:[%s5601_s4 + $0x150] sm:$0xff] }
 0x849   :  { %v1903_v25 = vrot.slane %v1902_v23, 2  ;;  %v1916_v26 = vadd.f32 %v1915_v24, %v1914_v21  ;;  %v2255_v21 = vld [vmem:[#allocation3 + $0x358] sm:$0xff] }
 0x84a   :  { %v4620_v24 = vpack.c.bf16 %v2255_v21, %v2254_v20  ;;  %v2717_v20 = vld [vmem:[#allocation3 + $0x420] sm:$0xff]  ;;  %v2718_v21 = vld [vmem:[#allocation3 + $0x428] sm:$0xff] }
 0x84b   :  { %v1904_v27 = vadd.f32 %v1903_v25, %v1902_v23  ;;  %v1917_v28 = vrot.slane %v1916_v26, 2  ;;  %v2364_v23 = vld [vmem:[#allocation3 + $0x3d0] sm:$0xff]  ;;  %v2365_v25 = vld [vmem:[#allocation3 + $0x3d8] sm:$0xff] }
 0x84d   :  { %v1905_v29 = vrot.slane %v1904_v27, 1  ;;  %v1918_v30 = vadd.f32 %v1917_v28, %v1916_v26  ;;  %v4652_v26 = vpack.c.bf16 %v2365_v25, %v2364_v23  ;;  %v2257_v28 = vld [vmem:[#allocation3 + $0x368] sm:$0xff]  ;;  %v4686_v25 = vpack.c.bf16 %v2718_v21, %v2717_v20 }
 0x84e   :  { %v3097_v23 = vld [vmem:[%s5601_s4 + $0x190] sm:$0xff] }
 0x84f   :  { %v1906_v31 = vadd.f32 %v1905_v29, %v1904_v27  ;;  %v1919_v32 = vrot.slane %v1918_v30, 1  ;;  %v2256_v27 = vld [vmem:[#allocation3 + $0x360] sm:$0xff] }
 0x850   :  { %v2366_v29 = vld [vmem:[#allocation3 + $0x3e0] sm:$0xff] }
 0x851   :  { %3982 = vmatmul.mubr.f32.vlgmr.msra.gmra.mrb[18].mxu1 %v1906_v31  ;;  %v1920_v33 = vadd.f32 %v1919_v32, %v1918_v30  ;;  %v4624_v30 = vpack.c.bf16 %v2257_v28, %v2256_v27  ;;  %v2367_v31 = vld [vmem:[#allocation3 + $0x3e8] sm:$0xff]  ;;  %v2720_v27 = vld [vmem:[#allocation3 + $0x438] sm:$0xff]  ;;  %v3098_v28 = vld [vmem:[%s5601_s4 + $0x198] sm:$0xff] }
 0x852   :  { %4023 = vmatprep.mubr.msk.f32.mxu1 %vm4800_vm0, %v4799_v0  ;;  %4596 = vmatpush3.bf16.msra.mxu1 %v4595_v36  ;;  %v4656_v32 = vpack.c.bf16 %v2367_v31, %v2366_v29  ;;  %v3091_v29 = vld [vmem:[%s5601_s4 + $0x160] sm:$0xff]  ;;  %v2721_v31 = vld [vmem:[#allocation3 + $0x440] sm:$0xff] }
 0x853   :  { %4017 = vmatmul.mubr.f32.vlgmr.msra.gmra.mrb[16].mxu0 %v1920_v33  ;;  %4597 = vmatprep.subr.bf16.mxu1 %v4801_v1  ;;  %v2258_v33 = vld [vmem:[#allocation3 + $0x370] sm:$0xff] }
 0x854   :  { %4635 = vmatpush3.bf16.msra.mxu0 %v4632_v39 }
 0x855   :  { %4637 = vmatprep.subr.bf16.mxu0 %v4636_v42 }
 0x858   :  { %4639 = vmatpush3.bf16.msra.mxu0 %v4636_v42 }
 0x859   :  { %4641 = vmatprep.subr.bf16.mxu0 %v4640_v45 }
 0x85c   :  { %4643 = vmatpush3.bf16.msra.mxu0 %v4640_v45 }
 0x85d   :  { %4645 = vmatprep.subr.bf16.mxu0 %v4644_v49 }
 0x860   :  { %4647 = vmatpush3.bf16.msra.mxu0 %v4644_v49 }
 0x861   :  { %4649 = vmatprep.subr.bf16.mxu0 %v4648_v52 }
 0x864   :  { %4651 = vmatpush3.bf16.msra.mxu0 %v4648_v52 }
 0x865   :  { %4653 = vmatprep.subr.bf16.mxu0 %v4652_v26 }
 0x868   :  { %4655 = vmatpush3.bf16.msra.mxu0 %v4652_v26  ;;  %v2719_v26 = vld [vmem:[#allocation3 + $0x430] sm:$0xff] }
 0x869   :  { %4657 = vmatprep.subr.bf16.mxu0 %v4656_v32 }
 0x86c   :  { %4659 = vmatpush3.bf16.msra.mxu0 %v4656_v32  ;;  %v2722_v32 = vld [vmem:[#allocation3 + $0x448] sm:$0xff] }
 0x86d   :  { %4661 = vmatprep.subr.bf16.mxu0 %v4660_v38  ;;  %v4694_v35 = vpack.c.bf16 %v2722_v32, %v2721_v31  ;;  %v3119_v31 = vld [vmem:[%s5601_s4 + $0x1c0] sm:$0xff] }
 0x86e   :  { %v3123_v32 = vld [vmem:[%s5601_s4 + $0x1e0] sm:$0xff] }
 0x870   :  { %4663 = vmatpush3.bf16.msra.mxu0 %v4660_v38  ;;  %v3100_v38 = vld [vmem:[%s5601_s4 + $0x1a8] sm:$0xff] }
 0x871   :  { %4671 = vmatprep.subr.bf16.mxu0 %v4801_v1 }
 0x924   :  { %v1987_v53 = vpop.f32.mrb[18].mxu1 }
 0x925   :  { %v1991_v54 = vmul.f32 0.0025510204, %v1987_v53  ;;  %v3983_v55 = vpop.f32.mrb[19].mxu1 }
 0x926   :  { %v2058_v56 = vpop.f32.mrb[16].mxu0 }
 0x927   :  { %v2063_v57 = vmul.f32 %v1991_v54, %v1991_v54  ;;  %v2062_v58 = vmul.f32 0.0025510204, %v2058_v56  ;;  %v4018_v59 = vpop.f32.mrb[17].mxu0 }
 0x929   :  { %v2064_v60 = vsub.f32 %v2062_v58, %v2063_v57 }
 0x92b   :  { %v2065_v61 = vadd.f32 1e-05, %v2064_v60 }
 0x92d   :  { %4742 = vrsqrt.f32 %v2065_v61 }
 0x937   :  { %v4743_v19 = vpop.eup %4742 }
 0x938   :  { %4024 = vmatmul.mubr.msk.f32.vlgmr.msra.gmra.mrb[20].mxu1 %vm1112_vm5, %v4743_v19  ;;  %v2140_v5 = vmul.f32 %v4743_v19, %v1991_v54  ;;  %v2714_v19 = vld [vmem:[#allocation3 + $0x408] sm:$0xff] }
 0x939   :  { %4599 = vmatpush3.bf16.msra.mxu1 %v4595_v36  ;;  %4030 = vmatprep.mubr.msk.f32.mxu1 %vm4800_vm0, %v4799_v0  ;;  %v4628_v36 = vpack.c.bf16 %v2259_v34, %v2258_v33  ;;  %v3099_v33 = vld [vmem:[%s5601_s4 + $0x1a0] sm:$0xff]  ;;  %v3092_v34 = vld [vmem:[%s5601_s4 + $0x168] sm:$0xff] }
 0x93a   :  { %4601 = vmatprep.subr.bf16.mxu1 %v4600_v2 }
 0x93c   :  { %4031 = vmatmul.mubr.msk.f32.vlgmr.msra.gmra.mrb[22].mxu1 %vm1112_vm5, %v2140_v5 }
 0x93d   :  { %4603 = vmatpush3.bf16.msra.mxu1 %v4600_v2  ;;  %v2713_v2 = vld [vmem:[#allocation3 + $0x400] sm:$0xff] }
 0x93e   :  { %4605 = vmatprep.subr.bf16.mxu1 %v4604_v7  ;;  %v4678_v9 = vpack.c.bf16 %v2714_v19, %v2713_v2 }
 0x941   :  { %4607 = vmatpush3.bf16.msra.mxu1 %v4604_v7 }
 0x942   :  { %4609 = vmatprep.subr.bf16.mxu1 %v4608_v11 }
 0x945   :  { %4611 = vmatpush3.bf16.msra.mxu1 %v4608_v11 }
 0x946   :  { %4613 = vmatprep.subr.bf16.mxu1 %v4612_v15 }
 0x949   :  { %4615 = vmatpush3.bf16.msra.mxu1 %v4612_v15  ;;  %v2716_v15 = vld [vmem:[#allocation3 + $0x418] sm:$0xff] }
 0x94a   :  { %4617 = vmatprep.subr.bf16.mxu1 %v4616_v18 }
 0x94d   :  { %4619 = vmatpush3.bf16.msra.mxu1 %v4616_v18  ;;  %v4682_v18 = vpack.c.bf16 %v2716_v15, %v2715_v14 }
 0x94e   :  { %4621 = vmatprep.subr.bf16.mxu1 %v4620_v24 }
 0x951   :  { %4623 = vmatpush3.bf16.msra.mxu1 %v4620_v24  ;;  %v3090_v24 = vld [vmem:[%s5601_s4 + $0x158] sm:$0xff] }
 0x952   :  { %4625 = vmatprep.subr.bf16.mxu1 %v4624_v30 }
 0x955   :  { %4627 = vmatpush3.bf16.msra.mxu1 %v4624_v30  ;;  %v4690_v30 = vpack.c.bf16 %v2720_v27, %v2719_v26 }
 0x956   :  { %4629 = vmatprep.subr.bf16.mxu1 %v4628_v36 }
 0x959   :  { %4631 = vmatpush3.bf16.msra.mxu1 %v4628_v36  ;;  %v2723_v36 = vld [vmem:[#allocation3 + $0x450] sm:$0xff] }
 0x95a   :  { %4664 = vmatprep.subr.bf16.mxu1 %v4801_v1 }
 0xa0b   :  { %v2136_v39 = vpop.f32.mrb[20].mxu1 }
 0xa0c   :  { %v2218_v40 = vrot.slane %v2136_v39, %v5205_v46  ;;  %v4025_v41 = vpop.f32.mrb[21].mxu1  ;;  %v3093_v39 = vld [vmem:[%s5601_s4 + $0x170] sm:$0xff] }
 0xa0d   :  { %v2725_v41 = vld [vmem:[#allocation3 + $0x460] sm:$0xff] }
 0xa0e   :  { %v2220_v42 = vmul.f32 %v5349_v4, %v2218_v40  ;;  %v2219_v43 = vmul.f32 %v2218_v40, %v5353_v6  ;;  %v2221_v44 = vmul.f32 %v2218_v40, %v5363_v12  ;;  %v2222_v45 = vmul.f32 %v5359_v10, %v2218_v40 }
 0xa0f   :  { %v2210_v47 = vpop.f32.mrb[22].mxu1  ;;  %v4698_v40 = vpack.c.bf16 %v2724_v37, %v2723_v36  ;;  %v3134_v37 = vld [vmem:[%s5599_s2 + $0x6] ss:$0 sm:$0xff] }
 0xa10   :  { %v2226_v48 = vrot.slane %v2210_v47, %v5205_v46  ;;  %v4032_v49 = vpop.f32.mrb[23].mxu1  ;;  %v2727_v47 = vld [vmem:[#allocation3 + $0x470] sm:$0xff] }
 0xa11   :  { %v3102_v49 = vld [vmem:[%s5601_s4 + $0x1b8] sm:$0xff] }
 0xa12   :  { %v2228_v51 = vsub.f32 %v2220_v42, %v2226_v48  ;;  %v2227_v52 = vsub.f32 %v2219_v43, %v2226_v48  ;;  %v2229_v53 = vsub.f32 %v2221_v44, %v2226_v48  ;;  %v2230_v54 = vsub.f32 %v2222_v45, %v2226_v48  ;;  %v2726_v42 = vld [vmem:[#allocation3 + $0x468] sm:$0xff]  ;;  %v3094_v44 = vld [vmem:[%s5601_s4 + $0x178] sm:$0xff]  ;;  %v2728_v48 = vld [vmem:[#allocation3 + $0x478] sm:$0xff] }
 0xa13   :  { %v3101_v43 = vld [vmem:[%s5601_s4 + $0x1b0] sm:$0xff]  ;;  %v4702_v45 = vpack.c.bf16 %v2726_v42, %v2725_v41 }
 0xa14   :  { %v2235_v55 = vadd.f32 %v3088_v50, %v2227_v52  ;;  %v2236_v4 = vadd.f32 %v3088_v50, %v2228_v51  ;;  %v2237_v56 = vadd.f32 %v3088_v50, %v2229_v53  ;;  %v2238_v10 = vadd.f32 %v3088_v50, %v2230_v54  ;;  %v3095_v50 = vld [vmem:[%s5601_s4 + $0x180] sm:$0xff] }
 0xa15   :  { %v4706_v51 = vpack.c.bf16 %v2728_v48, %v2727_v47 }
 0xa16   :  { %v5395_v6 = vmax.f32 %v2235_v55, 0.0  ;;  %v5397_v12 = vmax.f32 %v2236_v4, 0.0  ;;  %v5401_v46 = vmax.f32 %v2237_v56, 0.0  ;;  %v5407_v57 = vmax.f32 %v2238_v10, 0.0 }
 0xa18   :  { %4065 = vmatprep.mubr.f32.mxu1 %v5395_v6  ;;  %4103 = vmatprep.mubr.f32.mxu0 %v5395_v6 }
 0xa19   :  { %4066 = vmatmul.mubr.f32.vlgmr.msra.gmra.mrb[24].mxu1 %v5397_v12  ;;  %4104 = vmatmul.mubr.f32.vlgmr.msra.gmra.mrb[18].mxu0 %v5397_v12 }
 0xa1a   :  { %4068 = vmatprep.mubr.f32.mxu1 %v5401_v46  ;;  %4106 = vmatprep.mubr.f32.mxu0 %v5401_v46 }
 0xa1d   :  { %4069 = vmatmul.mubr.f32.gmra.mrb[26].mxu1 %v5407_v57  ;;  %4107 = vmatmul.mubr.f32.gmra.mrb[20].mxu0 %v5407_v57 }
 0xa1e   :  { %4117 = vmatprep.mubr.msk.f32.mxu1 %vm4800_vm0, %v4799_v0  ;;  %4146 = vmatprep.mubr.msk.f32.mxu0 %vm4800_vm0, %v4799_v0 }
 0xaec   :  { %v4067_v58 = vpop.f32.mrb[24].mxu1  ;;  %v4105_v59 = vpop.f32.mrb[18].mxu0 }
 0xaed   :  { %v2326_v60 = vpop.f32.mrb[25].mxu1  ;;  %v2436_v61 = vpop.f32.mrb[19].mxu0 }
 0xaee   :  { %v4672_v62 = vpack.c.bf16 %v4067_v58, %v2326_v60  ;;  %v4665_v63 = vpack.c.bf16 %v4105_v59, %v2436_v61 }
 0xaf0   :  { %v4070_v22 = vpop.f32.mrb[26].mxu1  ;;  %v4108_v3 = vpop.f32.mrb[20].mxu0  ;;  %4666 = vmatpush3.bf16.msra.mxu1 %v4665_v63  ;;  %4673 = vmatpush3.bf16.msra.mxu0 %v4672_v62 }
 0xaf1   :  { %v2336_v5 = vpop.f32.mrb[27].mxu1  ;;  %v2446_v7 = vpop.f32.mrb[21].mxu0  ;;  %4667 = vmatprep.subr.bf16.mxu1 %v4801_v1  ;;  %4674 = vmatprep.subr.bf16.mxu0 %v4801_v1 }
 0xaf2   :  { %v4675_v11 = vpack.c.bf16 %v4070_v22, %v2336_v5  ;;  %v4668_v13 = vpack.c.bf16 %v4108_v3, %v2446_v7 }
 0xaf4   :  { %4670 = vmatpush3.bf16.msk.msra.mxu1 %vm5419_vm9, %v4668_v13  ;;  %4677 = vmatpush3.bf16.msk.msra.mxu0 %vm5419_vm9, %v4675_v11 }
 0xaf5   :  { %4679 = vmatprep.subr.bf16.mxu1 %v4678_v9  ;;  %4710 = vmatprep.subr.bf16.mxu0 %v4801_v1 }
 0xaf7   :  { %4118 = vmatmul.mubr.msk.f32.vlgmr.msra.gmra.mrb[28].mxu1 %vm2463_vm10, %v3096_v16  ;;  %4147 = vmatmul.mubr.msk.f32.vlgmr.msra.gmra.mrb[22].mxu0 %vm2463_vm10, %v3089_v17 }
 0xaf8   :  { %4681 = vmatpush3.bf16.msra.mxu1 %v4678_v9  ;;  %4120 = vmatprep.mubr.msk.f32.mxu1 %vm4800_vm0, %v4799_v0 }
 0xaf9   :  { %4683 = vmatprep.subr.bf16.mxu1 %v4682_v18  ;;  %4149 = vmatprep.mubr.msk.f32.mxu0 %vm4800_vm0, %v4799_v0 }
 0xafb   :  { %4121 = vmatmul.mubr.msk.f32.gmra.mrb[30].mxu1 %vm2463_vm10, %v3097_v23  ;;  %4150 = vmatmul.mubr.msk.f32.gmra.mrb[24].mxu0 %vm2463_vm10, %v3090_v24 }
 0xafc   :  { %4685 = vmatpush3.bf16.msra.mxu1 %v4682_v18  ;;  %4123 = vmatprep.mubr.msk.f32.mxu1 %vm4800_vm0, %v4799_v0 }
 0xafd   :  { %4687 = vmatprep.subr.bf16.mxu1 %v4686_v25  ;;  %4152 = vmatprep.mubr.msk.f32.mxu0 %vm4800_vm0, %v4799_v0 }
 0xaff   :  { %4124 = vmatmul.mubr.msk.f32.gmra.mrb[32].mxu1 %vm2463_vm10, %v3098_v28  ;;  %4153 = vmatmul.mubr.msk.f32.gmra.mrb[26].mxu0 %vm2463_vm10, %v3091_v29 }
 0xb00   :  { %4689 = vmatpush3.bf16.msra.mxu1 %v4686_v25  ;;  %4126 = vmatprep.mubr.msk.f32.mxu1 %vm4800_vm0, %v4799_v0 }
 0xb01   :  { %4691 = vmatprep.subr.bf16.mxu1 %v4690_v30  ;;  %4155 = vmatprep.mubr.msk.f32.mxu0 %vm4800_vm0, %v4799_v0 }
 0xb03   :  { %4127 = vmatmul.mubr.msk.f32.gmra.mrb[34].mxu1 %vm2463_vm10, %v3099_v33  ;;  %4156 = vmatmul.mubr.msk.f32.gmra.mrb[28].mxu0 %vm2463_vm10, %v3092_v34  ;;  %v3121_v33 = vld [vmem:[%s5601_s4 + $0x1d0] sm:$0xff] }
 0xb04   :  { %4693 = vmatpush3.bf16.msra.mxu1 %v4690_v30  ;;  %4129 = vmatprep.mubr.msk.f32.mxu1 %vm4800_vm0, %v4799_v0  ;;  %v3125_v34 = vld [vmem:[%s5601_s4 + $0x1f0] sm:$0xff] }
 0xb05   :  { %4695 = vmatprep.subr.bf16.mxu1 %v4694_v35  ;;  %4158 = vmatprep.mubr.msk.f32.mxu0 %vm4800_vm0, %v4799_v0 }
 0xb07   :  { %4130 = vmatmul.mubr.msk.f32.gmra.mrb[36].mxu1 %vm2463_vm10, %v3100_v38  ;;  %4159 = vmatmul.mubr.msk.f32.gmra.mrb[30].mxu0 %vm2463_vm10, %v3093_v39 }
 0xb08   :  { %4697 = vmatpush3.bf16.msra.mxu1 %v4694_v35  ;;  %4132 = vmatprep.mubr.msk.f32.mxu1 %vm4800_vm0, %v4799_v0  ;;  %v3122_v35 = vld [vmem:[%s5601_s4 + $0x1d8] sm:$0xff] }
 0xb09   :  { %4699 = vmatprep.subr.bf16.mxu1 %v4698_v40  ;;  %4161 = vmatprep.mubr.msk.f32.mxu0 %vm4800_vm0, %v4799_v0 }
 0xb0b   :  { %4133 = vmatmul.mubr.msk.f32.gmra.mrb[38].mxu1 %vm2463_vm10, %v3101_v43  ;;  %4162 = vmatmul.mubr.msk.f32.gmra.mrb[32].mxu0 %vm2463_vm10, %v3094_v44 }
 0xb0c   :  { %4701 = vmatpush3.bf16.msra.mxu1 %v4698_v40  ;;  %4135 = vmatprep.mubr.msk.f32.mxu1 %vm4800_vm0, %v4799_v0 }
 0xb0d   :  { %4703 = vmatprep.subr.bf16.mxu1 %v4702_v45  ;;  %4164 = vmatprep.mubr.msk.f32.mxu0 %vm4800_vm0, %v4799_v0 }
 0xb0f   :  { %4136 = vmatmul.mubr.msk.f32.gmra.mrb[40].mxu1 %vm2463_vm10, %v3102_v49  ;;  %4165 = vmatmul.mubr.msk.f32.gmra.mrb[34].mxu0 %vm2463_vm10, %v3095_v50 }
 0xb10   :  { %4705 = vmatpush3.bf16.msra.mxu1 %v4702_v45  ;;  %4199 = vmatprep.mubr.f32.mxu1 %v5395_v6 }
 0xb11   :  { %4707 = vmatprep.subr.bf16.mxu1 %v4706_v51  ;;  %4213 = vmatprep.mubr.msk.f32.mxu0 %vm4800_vm0, %v4799_v0 }
 0xb14   :  { %4709 = vmatpush3.bf16.msra.mxu1 %v4706_v51 }
 0xb15   :  { %4717 = vmatprep.subr.bf16.mxu1 %v4801_v1 }
 0xb17   :  { %4200 = vmatmul.mubr.f32.vlgmr.msra.gmra.mrb[42].mxu1 %v5397_v12 }
 0xb18   :  { %4202 = vmatprep.mubr.f32.mxu1 %v5401_v46 }
 0xb1b   :  { %4203 = vmatmul.mubr.f32.gmra.mrb[44].mxu1 %v5407_v57 }
 0xb1c   :  { %4225 = vmatprep.mubr.msk.f32.mxu1 %vm4800_vm0, %v4799_v0 }
 0xbca   :  { %v2554_v52 = vpop.f32.mrb[28].mxu1  ;;  %v2678_v53 = vpop.f32.mrb[22].mxu0 }
 0xbcb   :  { %v4119_v54 = vpop.f32.mrb[29].mxu1  ;;  %v5517_v55 = vadd.f32 %v2678_v53, %v2554_v52  ;;  %v4148_v4 = vpop.f32.mrb[23].mxu0 }
 0xbce   :  { %v2559_v56 = vpop.f32.mrb[30].mxu1  ;;  %v2683_v6 = vpop.f32.mrb[24].mxu0 }
 0xbcf   :  { %v4122_v10 = vpop.f32.mrb[31].mxu1  ;;  %v5519_v58 = vadd.f32 %v2683_v6, %v2559_v56  ;;  %v4151_v59 = vpop.f32.mrb[25].mxu0 }
 0xbd2   :  { %v2564_v12 = vpop.f32.mrb[32].mxu1  ;;  %v2688_v60 = vpop.f32.mrb[26].mxu0 }
 0xbd3   :  { %v4125_v46 = vpop.f32.mrb[33].mxu1  ;;  %v5521_v61 = vadd.f32 %v2688_v60, %v2564_v12  ;;  %v4154_v57 = vpop.f32.mrb[27].mxu0 }
 0xbd6   :  { %v2569_v62 = vpop.f32.mrb[34].mxu1  ;;  %v2693_v63 = vpop.f32.mrb[28].mxu0 }
 0xbd7   :  { %v4128_v2 = vpop.f32.mrb[35].mxu1  ;;  %v5523_v19 = vadd.f32 %v2693_v63, %v2569_v62  ;;  %v4157_v22 = vpop.f32.mrb[29].mxu0 }
 0xbda   :  { %v2574_v3 = vpop.f32.mrb[36].mxu1  ;;  %v2698_v5 = vpop.f32.mrb[30].mxu0 }
 0xbdb   :  { %v4131_v7 = vpop.f32.mrb[37].mxu1  ;;  %v2699_v9 = vadd.f32 %v2698_v5, %v2574_v3  ;;  %v4160_v11 = vpop.f32.mrb[31].mxu0 }
 0xbde   :  { %v2579_v13 = vpop.f32.mrb[38].mxu1  ;;  %v2703_v14 = vpop.f32.mrb[32].mxu0 }
 0xbdf   :  { %v4134_v15 = vpop.f32.mrb[39].mxu1  ;;  %v2704_v16 = vadd.f32 %v2703_v14, %v2579_v13  ;;  %v4163_v17 = vpop.f32.mrb[33].mxu0 }
 0xbe2   :  { %v2584_v18 = vpop.f32.mrb[40].mxu1  ;;  %v2708_v20 = vpop.f32.mrb[34].mxu0 }
 0xbe3   :  { %v4137_v21 = vpop.f32.mrb[41].mxu1  ;;  %v2709_v23 = vadd.f32 %v2708_v20, %v2584_v18  ;;  %v4166_v24 = vpop.f32.mrb[35].mxu0 }
 0xbea   :  { %v4201_v25 = vpop.f32.mrb[42].mxu1 }
 0xbeb   :  { %v2795_v26 = vpop.f32.mrb[43].mxu1 }
 0xbec   :  { %v4711_v27 = vpack.c.bf16 %v4201_v25, %v2795_v26 }
 0xbee   :  { %v4204_v28 = vpop.f32.mrb[44].mxu1  ;;  %4712 = vmatpush3.bf16.msra.mxu0 %v4711_v27  ;;  %4719 = vmatpush3.bf16.msra.mxu1 %v4711_v27 }
 0xbef   :  { %v2805_v29 = vpop.f32.mrb[45].mxu1  ;;  %4713 = vmatprep.subr.bf16.mxu0 %v4801_v1  ;;  %4718 = vmatprep.subr.bf16.mxu1 %v4801_v1  ;;  %v3120_v1 = vld [vmem:[%s5601_s4 + $0x1c8] sm:$0xff] }
 0xbf0   :  { %v4714_v30 = vpack.c.bf16 %v4204_v28, %v2805_v29 }
 0xbf2   :  { %4716 = vmatpush3.bf16.msk.msra.mxu0 %vm5419_vm9, %v4714_v30  ;;  %4720 = vmatpush3.bf16.msk.msra.mxu1 %vm5419_vm9, %v4714_v30 }
 0xbf5   :  { %4214 = vmatmul.mubr.msk.f32.vlgmr.msra.gmra.mrb[36].mxu0 %vm2463_vm10, %v3119_v31  ;;  %4226 = vmatmul.mubr.msk.f32.vlgmr.msra.gmra.mrb[46].mxu1 %vm2463_vm10, %v3123_v32 }
 0xbf6   :  { %4216 = vmatprep.mubr.msk.f32.mxu0 %vm4800_vm0, %v4799_v0  ;;  %4228 = vmatprep.mubr.msk.f32.mxu1 %vm4800_vm0, %v4799_v0 }
 0xbf9   :  { %4217 = vmatmul.mubr.msk.f32.gmra.mrb[38].mxu0 %vm2463_vm10, %v3120_v1  ;;  %4229 = vmatmul.mubr.msk.f32.gmra.mrb[48].mxu1 %vm2463_vm10, %v3124_v8 }
 0xbfa   :  { %4219 = vmatprep.mubr.msk.f32.mxu0 %vm4800_vm0, %v4799_v0  ;;  %4231 = vmatprep.mubr.msk.f32.mxu1 %vm4800_vm0, %v4799_v0 }
 0xbfd   :  { %4220 = vmatmul.mubr.msk.f32.gmra.mrb[40].mxu0 %vm2463_vm10, %v3121_v33  ;;  %4232 = vmatmul.mubr.msk.f32.gmra.mrb[50].mxu1 %vm2463_vm10, %v3125_v34 }
 0xbfe   :  { %4222 = vmatprep.mubr.msk.f32.mxu0 %vm4800_vm0, %v4799_v0 }
 0xc01   :  { %4223 = vmatmul.mubr.msk.f32.gmra.mrb[42].mxu0 %vm2463_vm10, %v3122_v35 }
 0xcc8   :  { %v2912_v36 = vpop.f32.mrb[36].mxu0  ;;  %v2932_v38 = vpop.f32.mrb[46].mxu1 }
 0xcc9   :  { %v2946_v39 = vadd.f32 %v2912_v36, %v5517_v55  ;;  %v2950_v40 = vadd.f32 %v2932_v38, %v2699_v9  ;;  %v4215_v41 = vpop.f32.mrb[37].mxu0  ;;  %v4227_v42 = vpop.f32.mrb[47].mxu1 }
 0xccb   :  { %v2958_v43 = vadd.f32 %v3134_v37, %v2946_v39  ;;  %v2962_v44 = vadd.f32 %v3134_v37, %v2950_v40 }
 0xccc   :  { %v2917_v0 = vpop.f32.mrb[38].mxu0  ;;  %v2937_v45 = vpop.f32.mrb[48].mxu1 }
 0xccd   :  { %v3135_v47 = vmul.f32 -1.442695, %v2958_v43  ;;  %v3139_v48 = vmul.f32 -1.442695, %v2962_v44  ;;  %v2947_v49 = vadd.f32 %v2917_v0, %v5519_v58  ;;  %v2951_v50 = vadd.f32 %v2937_v45, %v2704_v16  ;;  %v4218_v51 = vpop.f32.mrb[39].mxu0  ;;  %v4230_v52 = vpop.f32.mrb[49].mxu1 }
 0xccf   :  { %4744 = vpow2.f32 %v3135_v47  ;;  %v2959_v53 = vadd.f32 %v3134_v37, %v2947_v49  ;;  %v2963_v54 = vadd.f32 %v3134_v37, %v2951_v50 }
 0xcd0   :  { %4746 = vpow2.f32 %v3139_v48  ;;  %v2922_v4 = vpop.f32.mrb[40].mxu0  ;;  %v2942_v55 = vpop.f32.mrb[50].mxu1 }
 0xcd1   :  { %v3136_v56 = vmul.f32 -1.442695, %v2959_v53  ;;  %v3140_v6 = vmul.f32 -1.442695, %v2963_v54  ;;  %v2948_v10 = vadd.f32 %v2922_v4, %v5521_v61  ;;  %v2952_v59 = vadd.f32 %v2942_v55, %v2709_v23  ;;  %v4221_v12 = vpop.f32.mrb[41].mxu0  ;;  %v4233_v60 = vpop.f32.mrb[51].mxu1 }
 0xcd3   :  { %4748 = vpow2.f32 %v3136_v56  ;;  %v2960_v46 = vadd.f32 %v3134_v37, %v2948_v10  ;;  %v2964_v57 = vadd.f32 %v3134_v37, %v2952_v59 }
 0xcd4   :  { %4750 = vpow2.f32 %v3140_v6  ;;  %v2927_v58 = vpop.f32.mrb[42].mxu0 }
 0xcd5   :  { %v3137_v62 = vmul.f32 -1.442695, %v2960_v46  ;;  %v3141_v63 = vmul.f32 -1.442695, %v2964_v57  ;;  %v2949_v2 = vadd.f32 %v2927_v58, %v5523_v19  ;;  %v4224_v22 = vpop.f32.mrb[43].mxu0 }
 0xcd7   :  { %4752 = vpow2.f32 %v3137_v62  ;;  %v2961_v3 = vadd.f32 %v3134_v37, %v2949_v2 }
 0xcd8   :  { %4754 = vpow2.f32 %v3141_v63 }
 0xcd9   :  { %v4745_v5 = vpop.eup %4744  ;;  %v3138_v7 = vmul.f32 -1.442695, %v2961_v3 }
 0xcda   :  { %v4747_v9 = vpop.eup %4746  ;;  %v2986_v61 = vadd.f32 1.0, %v4745_v5 }
 0xcdb   :  { %v2990_v11 = vadd.f32 1.0, %v4747_v9  ;;  %4756 = vpow2.f32 %v3138_v7 }
 0xcdc   :  { %4758 = vrcp.f32 %v2986_v61 }
 0xcdd   :  { %v4749_v13 = vpop.eup %4748  ;;  %4760 = vrcp.f32 %v2990_v11 }
 0xcde   :  { %v4751_v14 = vpop.eup %4750  ;;  %v2987_v15 = vadd.f32 1.0, %v4749_v13 }
 0xcdf   :  { %v2991_v16 = vadd.f32 1.0, %v4751_v14 }
 0xce0   :  { %4762 = vrcp.f32 %v2987_v15 }
 0xce1   :  { %v4753_v17 = vpop.eup %4752  ;;  %4764 = vrcp.f32 %v2991_v16 }
 0xce2   :  { %v4755_v19 = vpop.eup %4754  ;;  %v2988_v18 = vadd.f32 1.0, %v4753_v17 }
 0xce3   :  { %v2992_v20 = vadd.f32 1.0, %v4755_v19 }
 0xce4   :  { %4766 = vrcp.f32 %v2988_v18 }
 0xce5   :  { %v4757_v21 = vpop.eup %4756  ;;  %4768 = vrcp.f32 %v2992_v20 }
 0xce6   :  { %v4759_v23 = vpop.eup %4758  ;;  %v2989_v24 = vadd.f32 1.0, %v4757_v21 }
 0xce7   :  { %v4761_v25 = vpop.eup %4760  ;;  %3007 = vst [vmem:[%s5604_s7] sm:$0xff] %v4759_v23 }
 0xce8   :  { %3011 = vst [vmem:[%s5604_s7 + $0x20] sm:$0xff] %v4761_v25  ;;  %4770 = vrcp.f32 %v2989_v24 }
 0xcea   :  { %v4763_v26 = vpop.eup %4762 }
 0xceb   :  { %v4765_v27 = vpop.eup %4764  ;;  %3008 = vst [vmem:[%s5604_s7 + $0x8] sm:$0xff] %v4763_v26 }
 0xcec   :  { %3012 = vst [vmem:[%s5604_s7 + $0x28] sm:$0xff] %v4765_v27 }
 0xcee   :  { %v4767_v28 = vpop.eup %4766 }
 0xcef   :  { %v4769_v29 = vpop.eup %4768  ;;  %3009 = vst [vmem:[%s5604_s7 + $0x10] sm:$0xff] %v4767_v28 }
 0xcf0   :  { %3013 = vst [vmem:[%s5604_s7 + $0x30] sm:$0xff] %v4769_v29 }
 0xcf2   :  { %v4771_v30 = vpop.eup %4770 }
 0xcf3   :  { %3010 = vst [vmem:[%s5604_s7 + $0x18] sm:$0xff] %v4771_v30 }
 0xcf4   :  { %3018 = vsyncpa [#allocation4], 1 }

</bundles_post_ra>
